<compile_context>
chip_gen: v7x
topology: tpu7x:2x2x1
jax: 0.10.0
libtpu: 0.0.40
codegen_flags: <defaults>
</compile_context>

<pallas_src>
import jax
import jax.numpy as jnp
from jax import lax
from jax.experimental import pallas as pl
from jax.experimental.pallas import tpu as pltpu

EPS = 1e-6


# ----------------------------------------------------------------------------
# Kernel
# ----------------------------------------------------------------------------
def _ln_relu(y, gamma, beta):
    """channels_first LayerNorm over the channel (sublane) axis + ReLU.

    y: (C, HW) f32, gamma/beta: (C, 1) f32.  Single-pass statistics and
    lax.rsqrt (EUP slot); all f32 (v5e has no bf16 VPU/EUP).
    """
    mu = jnp.mean(y, axis=0, keepdims=True)                  # (1, HW)
    ex2 = jnp.mean(y * y, axis=0, keepdims=True)
    var = jnp.maximum(ex2 - mu * mu, 0.0)
    inv = lax.rsqrt(var + EPS)
    return jnp.maximum((y - mu) * inv * gamma + beta, 0.0)


def _make_db1_kernel(H, W, Cin, C, has_z):
    HW = H * W
    PAD = 2 * W + 2  # flat zero halo per side; covers every dilated-tap shift

    def kernel(*refs):
        if has_z:
            x_ref, z_ref, w1_ref, w2_ref, pp_ref, wm_ref, o_ref = refs
        else:
            x_ref, w1_ref, w2_ref, pp_ref, wm_ref, o_ref = refs
            z_ref = None

        pp = pp_ref[...]                                     # (C, 8) f32
        b1, g1, be1 = pp[:, 0:1], pp[:, 1:2], pp[:, 2:3]
        b2, g2, be2 = pp[:, 3:4], pp[:, 4:5], pp[:, 5:6]

        # ---- squeeze1: 1x1 conv (channel matmul) + LayerNorm(C) + ReLU -----
        # Lane-dense (C, HW) layout throughout: no transposes of x / z / out.
        y1 = jnp.dot(w1_ref[...], x_ref[0],
                     preferred_element_type=jnp.float32) + b1        # (C, HW) f32
        x1 = _ln_relu(y1, g1, be1)

        # ---- s = x1 (+ z); bf16 copy with a flat zero halo ------------------
        s = x1 + z_ref[0] if has_z else x1            # bf16 z upcasts to f32
        zpad = jnp.zeros((C, PAD), jnp.bfloat16)
        spl = jnp.concatenate([zpad, s.astype(jnp.bfloat16), zpad], axis=1)

        # ---- dilated 3x3 conv (dilation=2, padding=2) ------------------------
        # tap (kh, kw) of output pixel r is spl[:, 2*kh*W + 2*kw + r]; rows
        # outside the image land in the zero halo, and column wrap-around is
        # killed by the kw mask.  One accumulating K=3C matmul per kh.
        wm = wm_ref[...]                                     # (8, HW) bf16, rows 0..2 used
        y2 = jnp.zeros((C, HW), jnp.float32)
        for kh in range(3):
            taps = []
            for kw in range(3):
                off = 2 * kh * W + 2 * kw
                tap = spl[:, off:off + HW]                   # (C, HW) bf16
                if kw != 1:                                  # kw==1 never wraps
                    tap = tap * wm[kw:kw + 1, :]
                taps.append(tap)
            stacked = jnp.concatenate(taps, axis=0)          # (3C, HW) bf16, sublane concat
            w2_kh = w2_ref[kh * C:(kh + 1) * C, :]           # (C, 3C) bf16
            y2 = y2 + jnp.dot(w2_kh, stacked,
                              preferred_element_type=jnp.float32)

        y2 = _ln_relu(y2 + b2, g2, be2)                      # (C, HW) f32

        # ---- residual add + lane-dense (C, HW) store -------------------------
        o_ref[0] = (x1 + y2).astype(o_ref.dtype)

    return kernel


# ----------------------------------------------------------------------------
# pallas_call wrapper (NCHW in, NCHW out)
# ----------------------------------------------------------------------------
def db1_pallas(params, x_nchw, z_nchw=None, out_dtype=jnp.float32):
    N, Cin, H, W = x_nchw.shape
    C = params["b1"].shape[0]
    HW = H * W
    if z_nchw is not None and z_nchw.shape[2:] != (H, W):
        z_nchw = bilinear_align_corners(z_nchw, H, W)
    has_z = z_nchw is not None

    # MXU-layout weights (bf16); packed bias/LN params (f32); kw wrap masks.
    w1 = params["w1_oihw"][:, :, 0, 0].astype(jnp.bfloat16)             # (C, Cin)
    w2 = jnp.transpose(params["w2_oihw"], (2, 0, 3, 1)).reshape(3 * C, 3 * C)
    w2 = w2.astype(jnp.bfloat16)                 # rows = (kh, co), cols = (kw, ci)
    zc = jnp.zeros((C,), jnp.float32)
    pp = jnp.stack([params["b1"], params["g1"], params["beta1"],
                    params["b2"], params["g2"], params["beta2"], zc, zc],
                   axis=1).astype(jnp.float32)                          # (C, 8)
    ww = jnp.arange(HW, dtype=jnp.int32) % W
    wm = jnp.stack(
        [((ww + 2 * kw - 2 >= 0) & (ww + 2 * kw - 2 < W)).astype(jnp.bfloat16)
         for kw in range(3)]
        + [jnp.zeros((HW,), jnp.bfloat16)] * 5, axis=0)                 # (8, HW)

    # bf16 at the HBM boundary: x / z are only ever consumed by the bf16 MXU.
    x2 = x_nchw.reshape(N, Cin, HW).astype(jnp.bfloat16)
    inputs = [x2]
    in_specs = [pl.BlockSpec((1, Cin, HW), lambda n: (n, 0, 0))]
    if has_z:
        inputs.append(z_nchw.reshape(N, C, HW).astype(jnp.bfloat16))
        in_specs.append(pl.BlockSpec((1, C, HW), lambda n: (n, 0, 0)))
    inputs += [w1, w2, pp, wm]
    in_specs += [
        pl.BlockSpec((C, Cin), lambda n: (0, 0)),
        pl.BlockSpec((3 * C, 3 * C), lambda n: (0, 0)),
        pl.BlockSpec((C, 8), lambda n: (0, 0)),
        pl.BlockSpec((8, HW), lambda n: (0, 0)),
    ]

    # Right-sized VMEM reservation: double-buffered blocks + in-kernel temps.
    out_bpe = jnp.dtype(out_dtype).itemsize
    block_bytes = (Cin * HW * 2 + (C * HW * 2 if has_z else 0) + C * HW * out_bpe
                   + C * Cin * 2 + 9 * C * C * 2 + C * 8 * 4 + 8 * HW * 2)
    temp_bytes = 6 * C * HW * 4 + 2 * 3 * C * HW * 2 + C * (HW + 4 * W + 4) * 2
    vmem_bytes = int(min(max(2 * block_bytes + temp_bytes + (2 << 20), 4 << 20),
                         64 << 20))

    out = pl.pallas_call(
        _make_db1_kernel(H, W, Cin, C, has_z),
        out_shape=jax.ShapeDtypeStruct((N, C, HW), out_dtype),
        grid_spec=pltpu.PrefetchScalarGridSpec(
            num_scalar_prefetch=0,
            grid=(N,),
            in_specs=in_specs,
            out_specs=pl.BlockSpec((1, C, HW), lambda n: (n, 0, 0)),
        ),
        compiler_params=pltpu.CompilerParams(
            dimension_semantics=("parallel",),
            vmem_limit_bytes=vmem_bytes,
        ),
    )(*inputs)

    z_out = out.reshape(N, C, H, W)
    return z_out, z_out


# ----------------------------------------------------------------------------
# Glue: bilinear resize (plain JAX), parameter init, pure-JAX reference
# ----------------------------------------------------------------------------
def bilinear_align_corners(z, out_h, out_w):
    # F.interpolate(mode='bilinear', align_corners=True), NCHW input (JAX glue).
    N, C, H, W = z.shape
    ys = jnp.linspace(0.0, H - 1.0, out_h)
    xs = jnp.linspace(0.0, W - 1.0, out_w)
    y0 = jnp.floor(ys).astype(jnp.int32)
    x0 = jnp.floor(xs).astype(jnp.int32)
    y1 = jnp.minimum(y0 + 1, H - 1)
    x1 = jnp.minimum(x0 + 1, W - 1)
    wy = (ys - y0.astype(ys.dtype))[None, None, :, None]
    wx = (xs - x0.astype(xs.dtype))[None, None, None, :]
    z00 = z[:, :, y0][:, :, :, x0]
    z01 = z[:, :, y0][:, :, :, x1]
    z10 = z[:, :, y1][:, :, :, x0]
    z11 = z[:, :, y1][:, :, :, x1]
    top = z00 * (1 - wx) + z01 * wx
    bot = z10 * (1 - wx) + z11 * wx
    return top * (1 - wy) + bot * wy


def init_params(key, inplanes, outplanes):
    k1, k2 = jax.random.split(key)
    # kaiming_normal_(fan_in, relu): std = sqrt(2 / fan_in); biases 0; LN w=1 b=0
    std1 = (2.0 / (inplanes * 1 * 1)) ** 0.5
    std2 = (2.0 / (outplanes * 3 * 3)) ** 0.5
    w1_oihw = jax.random.normal(k1, (outplanes, inplanes, 1, 1), jnp.float32) * std1
    w2_oihw = jax.random.normal(k2, (outplanes, outplanes, 3, 3), jnp.float32) * std2
    return {
        "w1_oihw": w1_oihw,
        "b1": jnp.zeros((outplanes,), jnp.float32),
        "g1": jnp.ones((outplanes,), jnp.float32),
        "beta1": jnp.zeros((outplanes,), jnp.float32),
        "w2_oihw": w2_oihw,
        "b2": jnp.zeros((outplanes,), jnp.float32),
        "g2": jnp.ones((outplanes,), jnp.float32),
        "beta2": jnp.zeros((outplanes,), jnp.float32),
    }


def ref_forward(p, x, z, mxu_dtype=jnp.float32):
    # pure-JAX reference matching the PyTorch module; mxu_dtype=bfloat16 mimics
    # the kernel's bf16 HBM boundary / MXU inputs (f32 accumulation).
    def ln_cf(y, g, b):
        u = y.mean(1, keepdims=True)
        s = ((y - u) ** 2).mean(1, keepdims=True)
        yn = (y - u) / jnp.sqrt(s + EPS)
        return g[None, :, None, None] * yn + b[None, :, None, None]

    if z is not None:
        if z.shape[2:] != x.shape[2:]:
            z = bilinear_align_corners(z, x.shape[2], x.shape[3])
        z = z.astype(mxu_dtype).astype(jnp.float32)  # mirror the kernel boundary
    dn = ("NCHW", "OIHW", "NCHW")
    w1 = p["w1_oihw"].astype(mxu_dtype)
    w2 = p["w2_oihw"].astype(mxu_dtype)
    y = lax.conv_general_dilated(x.astype(mxu_dtype), w1, (1, 1), "VALID",
                                 dimension_numbers=dn,
                                 preferred_element_type=jnp.float32)
    y = y + p["b1"][None, :, None, None]
    y = jnp.maximum(ln_cf(y, p["g1"], p["beta1"]), 0.0)
    s = y if z is None else y + z
    y2 = lax.conv_general_dilated(s.astype(mxu_dtype), w2, (1, 1),
                                  ((2, 2), (2, 2)), rhs_dilation=(2, 2),
                                  dimension_numbers=dn,
                                  preferred_element_type=jnp.float32)
    y2 = y2 + p["b2"][None, :, None, None]
    y2 = jnp.maximum(ln_cf(y2, p["g2"], p["beta2"]), 0.0)
    out = y + y2
    return out, out


if __name__ == "__main__":
    key = jax.random.PRNGKey(0)
    kp, kx, kz = jax.random.split(key, 3)

    N, inplanes, outplanes, H, W = 2, 8, 32, 16, 16
    params = init_params(kp, inplanes, outplanes)
    x = jax.random.normal(kx, (N, inplanes, H, W), jnp.float32)
    z = jax.random.normal(kz, (N, outplanes, H, W), jnp.float32)

    out, out_b = db1_pallas(params, x, z)
    out = jax.block_until_ready(out)
    assert out.shape == (N, outplanes, H, W) and out.dtype == jnp.float32

    # tight check vs. a reference fed the same bf16 HBM-boundary inputs
    ref_bf16, _ = ref_forward(params, x, z, mxu_dtype=jnp.bfloat16)
    assert jnp.allclose(out, ref_bf16, atol=2e-2, rtol=2e-2), "mismatch (bf16-matched ref)"
    # loose check vs. the full-f32 reference (only bf16 rounding differs)
    ref_f32, _ = ref_forward(params, x, z, mxu_dtype=jnp.float32)
    assert jnp.allclose(out, ref_f32, atol=2e-1, rtol=2e-1), "mismatch (f32 ref)"

    # z = None branch
    out_none, _ = db1_pallas(params, x, None)
    jax.block_until_ready(out_none)
    ref_none, _ = ref_forward(params, x, None, mxu_dtype=jnp.bfloat16)
    assert jnp.allclose(out_none, ref_none, atol=2e-2, rtol=2e-2)

    # z with a different spatial size (exercises the bilinear resize glue)
    z_small = jax.random.normal(kz, (N, outplanes, H // 2, W // 2), jnp.float32)
    out_rs, _ = db1_pallas(params, x, z_small)
    jax.block_until_ready(out_rs)
    ref_rs, _ = ref_forward(params, x, z_small, mxu_dtype=jnp.bfloat16)
    assert jnp.allclose(out_rs, ref_rs, atol=2e-2, rtol=2e-2)

    # bf16 output variant (halves the HBM write stream; review item 2)
    out_bf, _ = db1_pallas(params, x, z, out_dtype=jnp.bfloat16)
    jax.block_until_ready(out_bf)
    assert out_bf.dtype == jnp.bfloat16
    assert jnp.allclose(out_bf.astype(jnp.float32), ref_bf16, atol=6e-2, rtol=6e-2)

    print("KERNEL_OK")
</pallas_src>

<mosaic_0001>
module attributes {stable_mosaic.version = 11 : i64} {
  func.func @kernel(%arg0: i32, %arg1: memref<1x8x256xbf16, #tpu.memory_space<vmem>>, %arg2: memref<1x32x256xbf16, #tpu.memory_space<vmem>>, %arg3: memref<32x8xbf16, #tpu.memory_space<vmem>>, %arg4: memref<96x96xbf16, #tpu.memory_space<vmem>>, %arg5: memref<32x8xf32, #tpu.memory_space<vmem>>, %arg6: memref<8x256xbf16, #tpu.memory_space<vmem>>, %arg7: memref<1x32x256xf32, #tpu.memory_space<vmem>>) attributes {dimension_semantics = [#tpu.dimension_semantics<parallel>], iteration_bounds = array<i64: 2>, scalar_prefetch = 0 : i64, scratch_operands = 0 : i64, tpu.core_type = #tpu.core_type<tc>, window_params = [{transform_indices = @transform_0, window_bounds = array<i64: 1, 8, 256>}, {transform_indices = @transform_1, window_bounds = array<i64: 1, 32, 256>}, {pipeline_mode = #tpu.pipeline_mode<synchronous>, transform_indices = @transform_2, window_bounds = array<i64: 32, 8>}, {pipeline_mode = #tpu.pipeline_mode<synchronous>, transform_indices = @transform_3, window_bounds = array<i64: 96, 96>}, {pipeline_mode = #tpu.pipeline_mode<synchronous>, transform_indices = @transform_4, window_bounds = array<i64: 32, 8>}, {pipeline_mode = #tpu.pipeline_mode<synchronous>, transform_indices = @transform_5, window_bounds = array<i64: 8, 256>}, {transform_indices = @transform_6, window_bounds = array<i64: 1, 32, 256>}]} {
    %c0 = arith.constant 0 : index
    %c0_0 = arith.constant 0 : index
    %0 = vector.load %arg5[%c0, %c0_0] : memref<32x8xf32, #tpu.memory_space<vmem>>, vector<32x8xf32>
    %1 = vector.extract_strided_slice %0 {offsets = [0, 0], sizes = [32, 1], strides = [1, 1]} : vector<32x8xf32> to vector<32x1xf32>
    %2 = vector.extract_strided_slice %0 {offsets = [0, 1], sizes = [32, 1], strides = [1, 1]} : vector<32x8xf32> to vector<32x1xf32>
    %3 = vector.extract_strided_slice %0 {offsets = [0, 2], sizes = [32, 1], strides = [1, 1]} : vector<32x8xf32> to vector<32x1xf32>
    %4 = vector.extract_strided_slice %0 {offsets = [0, 3], sizes = [32, 1], strides = [1, 1]} : vector<32x8xf32> to vector<32x1xf32>
    %5 = vector.extract_strided_slice %0 {offsets = [0, 4], sizes = [32, 1], strides = [1, 1]} : vector<32x8xf32> to vector<32x1xf32>
    %6 = vector.extract_strided_slice %0 {offsets = [0, 5], sizes = [32, 1], strides = [1, 1]} : vector<32x8xf32> to vector<32x1xf32>
    %c0_1 = arith.constant 0 : index
    %c0_2 = arith.constant 0 : index
    %7 = vector.load %arg3[%c0_1, %c0_2] : memref<32x8xbf16, #tpu.memory_space<vmem>>, vector<32x8xbf16>
    %c0_3 = arith.constant 0 : index
    %c0_4 = arith.constant 0 : index
    %c0_5 = arith.constant 0 : index
    %8 = vector.load %arg1[%c0_3, %c0_4, %c0_5] : memref<1x8x256xbf16, #tpu.memory_space<vmem>>, vector<1x8x256xbf16>
    %9 = vector.shape_cast %8 : vector<1x8x256xbf16> to vector<8x256xbf16>
    %cst = arith.constant dense<0.000000e+00> : vector<32x256xf32>
    %10 = tpu.matmul %7, %9, %cst {dimension_numbers = #tpu.dot_dimension_numbers<[1], [0], [0], [1], [0, 0, 1, 1], [], []>} : vector<32x8xbf16>, vector<8x256xbf16>, vector<32x256xf32> -> vector<32x256xf32>
    %11 = vector.broadcast %1 : vector<32x1xf32> to vector<32x256xf32>
    %12 = arith.addf %10, %11 : vector<32x256xf32>
    %cst_6 = arith.constant dense<0.000000e+00> : vector<256xf32>
    %13 = vector.multi_reduction <add>, %12, %cst_6 [0] : vector<32x256xf32> to vector<256xf32>
    %14 = vector.shape_cast %13 : vector<256xf32> to vector<1x256xf32>
    %cst_7 = arith.constant 3.200000e+01 : f32
    %15 = vector.broadcast %cst_7 : f32 to vector<1x256xf32>
    %16 = arith.divf %14, %15 : vector<1x256xf32>
    %17 = arith.mulf %12, %12 : vector<32x256xf32>
    %cst_8 = arith.constant dense<0.000000e+00> : vector<256xf32>
    %18 = vector.multi_reduction <add>, %17, %cst_8 [0] : vector<32x256xf32> to vector<256xf32>
    %19 = vector.shape_cast %18 : vector<256xf32> to vector<1x256xf32>
    %cst_9 = arith.constant 3.200000e+01 : f32
    %20 = vector.broadcast %cst_9 : f32 to vector<1x256xf32>
    %21 = arith.divf %19, %20 : vector<1x256xf32>
    %22 = arith.mulf %16, %16 : vector<1x256xf32>
    %23 = arith.subf %21, %22 : vector<1x256xf32>
    %cst_10 = arith.constant 0.000000e+00 : f32
    %24 = vector.broadcast %cst_10 : f32 to vector<1x256xf32>
    %25 = arith.maximumf %23, %24 : vector<1x256xf32>
    %cst_11 = arith.constant 9.99999997E-7 : f32
    %26 = vector.broadcast %cst_11 : f32 to vector<1x256xf32>
    %27 = arith.addf %25, %26 : vector<1x256xf32>
    %28 = math.rsqrt %27 : vector<1x256xf32>
    %29 = vector.broadcast %16 : vector<1x256xf32> to vector<32x256xf32>
    %30 = arith.subf %12, %29 : vector<32x256xf32>
    %31 = vector.broadcast %28 : vector<1x256xf32> to vector<32x256xf32>
    %32 = arith.mulf %30, %31 : vector<32x256xf32>
    %33 = vector.broadcast %2 : vector<32x1xf32> to vector<32x256xf32>
    %34 = arith.mulf %32, %33 : vector<32x256xf32>
    %35 = vector.broadcast %3 : vector<32x1xf32> to vector<32x256xf32>
    %36 = arith.addf %34, %35 : vector<32x256xf32>
    %cst_12 = arith.constant 0.000000e+00 : f32
    %37 = vector.broadcast %cst_12 : f32 to vector<32x256xf32>
    %38 = arith.maximumf %36, %37 : vector<32x256xf32>
    %c0_13 = arith.constant 0 : index
    %c0_14 = arith.constant 0 : index
    %c0_15 = arith.constant 0 : index
    %39 = vector.load %arg2[%c0_13, %c0_14, %c0_15] : memref<1x32x256xbf16, #tpu.memory_space<vmem>>, vector<1x32x256xbf16>
    %40 = vector.shape_cast %39 : vector<1x32x256xbf16> to vector<32x256xbf16>
    %41 = arith.extf %40 : vector<32x256xbf16> to vector<32x256xf32>
    %42 = arith.addf %38, %41 : vector<32x256xf32>
    %cst_16 = arith.constant 0.000000e+00 : bf16
    %43 = vector.broadcast %cst_16 : bf16 to vector<32x34xbf16>
    %44 = arith.truncf %42 : vector<32x256xf32> to vector<32x256xbf16>
    %45 = tpu.concatenate %43, %44, %43 in 1 : vector<32x34xbf16>, vector<32x256xbf16>, vector<32x34xbf16> -> vector<32x324xbf16>
    %c0_17 = arith.constant 0 : index
    %c0_18 = arith.constant 0 : index
    %46 = vector.load %arg6[%c0_17, %c0_18] : memref<8x256xbf16, #tpu.memory_space<vmem>>, vector<8x256xbf16>
    %cst_19 = arith.constant 0.000000e+00 : f32
    %47 = vector.broadcast %cst_19 : f32 to vector<32x256xf32>
    %48 = vector.extract_strided_slice %45 {offsets = [0, 0], sizes = [32, 256], strides = [1, 1]} : vector<32x324xbf16> to vector<32x256xbf16>
    %49 = vector.extract_strided_slice %46 {offsets = [0, 0], sizes = [1, 256], strides = [1, 1]} : vector<8x256xbf16> to vector<1x256xbf16>
    %50 = vector.broadcast %49 : vector<1x256xbf16> to vector<32x256xbf16>
    %51 = arith.mulf %48, %50 : vector<32x256xbf16>
    %52 = vector.extract_strided_slice %45 {offsets = [0, 2], sizes = [32, 256], strides = [1, 1]} : vector<32x324xbf16> to vector<32x256xbf16>
    %53 = vector.extract_strided_slice %45 {offsets = [0, 4], sizes = [32, 256], strides = [1, 1]} : vector<32x324xbf16> to vector<32x256xbf16>
    %54 = vector.extract_strided_slice %46 {offsets = [2, 0], sizes = [1, 256], strides = [1, 1]} : vector<8x256xbf16> to vector<1x256xbf16>
    %55 = vector.broadcast %54 : vector<1x256xbf16> to vector<32x256xbf16>
    %56 = arith.mulf %53, %55 : vector<32x256xbf16>
    %57 = tpu.concatenate %51, %52, %56 in 0 : vector<32x256xbf16>, vector<32x256xbf16>, vector<32x256xbf16> -> vector<96x256xbf16>
    %c0_20 = arith.constant 0 : index
    %c0_21 = arith.constant 0 : index
    %58 = vector.load %arg4[%c0_20, %c0_21] : memref<96x96xbf16, #tpu.memory_space<vmem>>, vector<32x96xbf16>
    %cst_22 = arith.constant dense<0.000000e+00> : vector<32x256xf32>
    %59 = tpu.matmul %58, %57, %cst_22 {dimension_numbers = #tpu.dot_dimension_numbers<[1], [0], [0], [1], [0, 0, 1, 1], [], []>} : vector<32x96xbf16>, vector<96x256xbf16>, vector<32x256xf32> -> vector<32x256xf32>
    %60 = arith.addf %47, %59 : vector<32x256xf32>
    %61 = vector.extract_strided_slice %45 {offsets = [0, 32], sizes = [32, 256], strides = [1, 1]} : vector<32x324xbf16> to vector<32x256xbf16>
    %62 = vector.extract_strided_slice %46 {offsets = [0, 0], sizes = [1, 256], strides = [1, 1]} : vector<8x256xbf16> to vector<1x256xbf16>
    %63 = vector.broadcast %62 : vector<1x256xbf16> to vector<32x256xbf16>
    %64 = arith.mulf %61, %63 : vector<32x256xbf16>
    %65 = vector.extract_strided_slice %45 {offsets = [0, 34], sizes = [32, 256], strides = [1, 1]} : vector<32x324xbf16> to vector<32x256xbf16>
    %66 = vector.extract_strided_slice %45 {offsets = [0, 36], sizes = [32, 256], strides = [1, 1]} : vector<32x324xbf16> to vector<32x256xbf16>
    %67 = vector.extract_strided_slice %46 {offsets = [2, 0], sizes = [1, 256], strides = [1, 1]} : vector<8x256xbf16> to vector<1x256xbf16>
    %68 = vector.broadcast %67 : vector<1x256xbf16> to vector<32x256xbf16>
    %69 = arith.mulf %66, %68 : vector<32x256xbf16>
    %70 = tpu.concatenate %64, %65, %69 in 0 : vector<32x256xbf16>, vector<32x256xbf16>, vector<32x256xbf16> -> vector<96x256xbf16>
    %c32 = arith.constant 32 : index
    %c0_23 = arith.constant 0 : index
    %71 = vector.load %arg4[%c32, %c0_23] : memref<96x96xbf16, #tpu.memory_space<vmem>>, vector<32x96xbf16>
    %cst_24 = arith.constant dense<0.000000e+00> : vector<32x256xf32>
    %72 = tpu.matmul %71, %70, %cst_24 {dimension_numbers = #tpu.dot_dimension_numbers<[1], [0], [0], [1], [0, 0, 1, 1], [], []>} : vector<32x96xbf16>, vector<96x256xbf16>, vector<32x256xf32> -> vector<32x256xf32>
    %73 = arith.addf %60, %72 : vector<32x256xf32>
    %74 = vector.extract_strided_slice %45 {offsets = [0, 64], sizes = [32, 256], strides = [1, 1]} : vector<32x324xbf16> to vector<32x256xbf16>
    %75 = vector.extract_strided_slice %46 {offsets = [0, 0], sizes = [1, 256], strides = [1, 1]} : vector<8x256xbf16> to vector<1x256xbf16>
    %76 = vector.broadcast %75 : vector<1x256xbf16> to vector<32x256xbf16>
    %77 = arith.mulf %74, %76 : vector<32x256xbf16>
    %78 = vector.extract_strided_slice %45 {offsets = [0, 66], sizes = [32, 256], strides = [1, 1]} : vector<32x324xbf16> to vector<32x256xbf16>
    %79 = vector.extract_strided_slice %45 {offsets = [0, 68], sizes = [32, 256], strides = [1, 1]} : vector<32x324xbf16> to vector<32x256xbf16>
    %80 = vector.extract_strided_slice %46 {offsets = [2, 0], sizes = [1, 256], strides = [1, 1]} : vector<8x256xbf16> to vector<1x256xbf16>
    %81 = vector.broadcast %80 : vector<1x256xbf16> to vector<32x256xbf16>
    %82 = arith.mulf %79, %81 : vector<32x256xbf16>
    %83 = tpu.concatenate %77, %78, %82 in 0 : vector<32x256xbf16>, vector<32x256xbf16>, vector<32x256xbf16> -> vector<96x256xbf16>
    %c64 = arith.constant 64 : index
    %c0_25 = arith.constant 0 : index
    %84 = vector.load %arg4[%c64, %c0_25] : memref<96x96xbf16, #tpu.memory_space<vmem>>, vector<32x96xbf16>
    %cst_26 = arith.constant dense<0.000000e+00> : vector<32x256xf32>
    %85 = tpu.matmul %84, %83, %cst_26 {dimension_numbers = #tpu.dot_dimension_numbers<[1], [0], [0], [1], [0, 0, 1, 1], [], []>} : vector<32x96xbf16>, vector<96x256xbf16>, vector<32x256xf32> -> vector<32x256xf32>
    %86 = arith.addf %73, %85 : vector<32x256xf32>
    %87 = vector.broadcast %4 : vector<32x1xf32> to vector<32x256xf32>
    %88 = arith.addf %86, %87 : vector<32x256xf32>
    %cst_27 = arith.constant dense<0.000000e+00> : vector<256xf32>
    %89 = vector.multi_reduction <add>, %88, %cst_27 [0] : vector<32x256xf32> to vector<256xf32>
    %90 = vector.shape_cast %89 : vector<256xf32> to vector<1x256xf32>
    %cst_28 = arith.constant 3.200000e+01 : f32
    %91 = vector.broadcast %cst_28 : f32 to vector<1x256xf32>
    %92 = arith.divf %90, %91 : vector<1x256xf32>
    %93 = arith.mulf %88, %88 : vector<32x256xf32>
    %cst_29 = arith.constant dense<0.000000e+00> : vector<256xf32>
    %94 = vector.multi_reduction <add>, %93, %cst_29 [0] : vector<32x256xf32> to vector<256xf32>
    %95 = vector.shape_cast %94 : vector<256xf32> to vector<1x256xf32>
    %cst_30 = arith.constant 3.200000e+01 : f32
    %96 = vector.broadcast %cst_30 : f32 to vector<1x256xf32>
    %97 = arith.divf %95, %96 : vector<1x256xf32>
    %98 = arith.mulf %92, %92 : vector<1x256xf32>
    %99 = arith.subf %97, %98 : vector<1x256xf32>
    %cst_31 = arith.constant 0.000000e+00 : f32
    %100 = vector.broadcast %cst_31 : f32 to vector<1x256xf32>
    %101 = arith.maximumf %99, %100 : vector<1x256xf32>
    %cst_32 = arith.constant 9.99999997E-7 : f32
    %102 = vector.broadcast %cst_32 : f32 to vector<1x256xf32>
    %103 = arith.addf %101, %102 : vector<1x256xf32>
    %104 = math.rsqrt %103 : vector<1x256xf32>
    %105 = vector.broadcast %92 : vector<1x256xf32> to vector<32x256xf32>
    %106 = arith.subf %88, %105 : vector<32x256xf32>
    %107 = vector.broadcast %104 : vector<1x256xf32> to vector<32x256xf32>
    %108 = arith.mulf %106, %107 : vector<32x256xf32>
    %109 = vector.broadcast %5 : vector<32x1xf32> to vector<32x256xf32>
    %110 = arith.mulf %108, %109 : vector<32x256xf32>
    %111 = vector.broadcast %6 : vector<32x1xf32> to vector<32x256xf32>
    %112 = arith.addf %110, %111 : vector<32x256xf32>
    %cst_33 = arith.constant 0.000000e+00 : f32
    %113 = vector.broadcast %cst_33 : f32 to vector<32x256xf32>
    %114 = arith.maximumf %112, %113 : vector<32x256xf32>
    %115 = arith.addf %38, %114 : vector<32x256xf32>
    %c0_34 = arith.constant 0 : index
    %c0_35 = arith.constant 0 : index
    %c0_36 = arith.constant 0 : index
    %116 = vector.load %arg7[%c0_34, %c0_35, %c0_36] : memref<1x32x256xf32, #tpu.memory_space<vmem>>, vector<1x32x256xf32>
    %117 = vector.shape_cast %116 : vector<1x32x256xf32> to vector<32x256xf32>
    %118 = vector.shape_cast %115 : vector<32x256xf32> to vector<1x32x256xf32>
    tpu.vector_store %arg7[%c0_34, %c0_35, %c0_36], %118 {strides = array<i32>} : memref<1x32x256xf32, #tpu.memory_space<vmem>>, vector<1x32x256xf32>,
    return
  }
  func.func @transform_0(%arg0: i32) -> (i32, i32, i32) {
    %c0_i32 = arith.constant 0 : i32
    %c0_i32_0 = arith.constant 0 : i32
    %c0_i32_1 = arith.constant 0 : i32
    return %arg0, %c0_i32, %c0_i32_0 : i32, i32, i32
  }
  func.func @transform_1(%arg0: i32) -> (i32, i32, i32) {
    %c0_i32 = arith.constant 0 : i32
    %c0_i32_0 = arith.constant 0 : i32
    %c0_i32_1 = arith.constant 0 : i32
    return %arg0, %c0_i32, %c0_i32_0 : i32, i32, i32
  }
  func.func @transform_2(%arg0: i32) -> (i32, i32) {
    %c0_i32 = arith.constant 0 : i32
    %c0_i32_0 = arith.constant 0 : i32
    %c0_i32_1 = arith.constant 0 : i32
    return %c0_i32, %c0_i32_0 : i32, i32
  }
  func.func @transform_3(%arg0: i32) -> (i32, i32) {
    %c0_i32 = arith.constant 0 : i32
    %c0_i32_0 = arith.constant 0 : i32
    %c0_i32_1 = arith.constant 0 : i32
    return %c0_i32, %c0_i32_0 : i32, i32
  }
  func.func @transform_4(%arg0: i32) -> (i32, i32) {
    %c0_i32 = arith.constant 0 : i32
    %c0_i32_0 = arith.constant 0 : i32
    %c0_i32_1 = arith.constant 0 : i32
    return %c0_i32, %c0_i32_0 : i32, i32
  }
  func.func @transform_5(%arg0: i32) -> (i32, i32) {
    %c0_i32 = arith.constant 0 : i32
    %c0_i32_0 = arith.constant 0 : i32
    %c0_i32_1 = arith.constant 0 : i32
    return %c0_i32, %c0_i32_0 : i32, i32
  }
  func.func @transform_6(%arg0: i32) -> (i32, i32, i32) {
    %c0_i32 = arith.constant 0 : i32
    %c0_i32_0 = arith.constant 0 : i32
    %c0_i32_1 = arith.constant 0 : i32
    return %arg0, %c0_i32, %c0_i32_0 : i32, i32, i32
  }
}

</mosaic_0001>

<bundles_post_ra>
// kernel: tpu_custom_call.1
= control target key start
LH: loop header
LB: loop body
LE: loop exit
PB: predicated region body
PF: predicated region fallthrough
CT: control target
= control target key end

     0   :  { %11 = vsyncpa [#allocation3], 0  ;;  %s2423_s0 = inlined_call_operand.vmem [shape: bf16[2,8,256], index: 0, kind: input, shape index: {}]   ;;  %s2424_s1 = inlined_call_operand.hbm [shape: bf16[2,32,256], index: 1, kind: input, shape index: {}]   ;;  %s2425_s2 = inlined_call_operand.vmem [shape: bf16[32,8], index: 2, kind: input, shape index: {}]   ;;  %s2426_s3 = inlined_call_operand.vmem [shape: bf16[96,96], index: 3, kind: input, shape index: {}]   ;;  %s2427_s4 = inlined_call_operand.vmem [shape: f32[32,8], index: 4, kind: input, shape index: {}]   ;;  %s2428_s5 = inlined_call_operand.hbm [shape: bf16[8,256], index: 5, kind: input, shape index: {}]   ;;  %s2429_s6 = inlined_call_operand.hbm [shape: f32[2,32,256], index: 6, kind: output, shape index: {}]  }
   0x1   :  { %13 = vsyncpa [#allocation3 + $0x1], 0 }
   0x2   :  { %14 = vsyncpa [#allocation6], 0 }
   0x3   :  { %15 = vsyncpa [#allocation4], 0 }
   0x4   :  { %17 = vsyncpa [#allocation4 + $0x1], 0  ;;  %s1815_s21 = smov 0   ;;  %s1817_s22 = smov 0  }
   0x5   :  { %s1819_s23 = smov 0   ;;  %s1821_s24 = smov 0  }
   0x6 LB: > { %s1836_s25 = sadd.s32 4294967295, %s1756_s24   ;;  %s1448_s26 = sadd.s32 4294967294, %s1756_s24   ;;  %s1756_s24 = sphi %s1821_s24, %s2456_s24   ;;  %s1752_s23 = sphi %s1819_s23, %s2455_s23   ;;  %s1748_s22 = sphi %s1817_s22, %s2454_s22   ;;  %s1744_s21 = sphi %s1815_s21, %s2453_s21  }
   0x7   : > { %s1840_s27 = sadd.s32 1, %s1756_s24   ;;  %s56_s28 = sadd.s32 1, %s1752_s23 }
   0x8   : > { %s53_s29 = ssub.s32 %s1756_s24, %s1840_s27  ;;  %p63_p0 = scmp.ne.s32.totalorder %s1752_s23, %s1748_s22 }
   0x9   : > { %p54_p1 = scmp.eq.s32.totalorder %s53_s29, 0  ;;  %p64_p2 = scmp.eq.s32.totalorder %s1756_s24, 0 }
   0xa   : > { %p69_p3 = scmp.ne.s32.totalorder %s1748_s22, %s1744_s21  ;;  %p2430_p4 = scmp.eq.s32.totalorder %s1836_s25, 0 }
   0xb   : > { %s1852_s30 = scalar_select %p54_p1, %s1752_s23, %s56_s28  }
   0xc   : > { %p1854_p5 = por %p64_p2, %p63_p0  ;;  %p1860_p6 = por %p2430_p4, %p69_p3 }
   0xd   : > { %2435 = sst [smem:[#allocation11_spill]] %s1852_s30  ;;  %p177_p7 = scmp.eq.s32.totalorder %s1836_s25, 1 }
   0xe   : > { %s2437_s8 = scalar_select %p1860_p6, 1, 0 }
   0xf   : > { %p183_p8 = scmp.eq.s32.totalorder %s1448_s26, 1  ;;  %p1449_p9 = scmp.ge.s32.totalorder %s1756_s24, 1 }
  0x10   : > { %p190_p10 = scmp.lt.s32.totalorder %s1756_s24, 3  ;;  %p1867_p11 = por %p177_p7, %p63_p0 }
  0x11   : > { %p1871_p12 = por %p183_p8, %p69_p3  ;;  %s1758_s12 = smov [#allocation5]  }
  0x12   : > { %s2438_s9 = scalar_select %p1867_p11, 1, 0 }
  0x13   : > { %s2439_s10 = scalar_select %p1871_p12, 1, 0 }
  0x14   : > { %p1875_p13 = pnand %p1449_p9, %p190_p10  ;;  %s212_s13 = sshll.u32 %s1758_s12, 4  ;;  %s213_s13 = int_to_ptr.vmem [resolvable:$true] %s212_s13 }
  0x15   : > { %p1539_p4 = scmp.lt.s32.totalorder %s1756_s24, 2  ;;  %p2441_p0 = scmp.eq.s32.totalorder %s1836_s25, 0 }
  0x16   : > { %s2440_s11 = scalar_select %p1875_p13, 1, 0 }
  0x17   : > { %p1526_p2 = pneg %p1875_p13  ;;  %s231_s15 = sand.u32 1, %s1752_s23  }
  0x18   : > { %p1892_p3 = pnand %p1539_p4, %p1854_p5  ;;  %s1452_s17 = sshll.u32 %s231_s15, 5 }
  0x19   : > { %p1885_p7 = pnand %p1526_p2, %p2441_p0  ;;  %s1628_s20 = scalar_lea.hbm %s2428_s5, 128 }
  0x1a   : > { %s2443_s16 = scalar_select %p1892_p3, 1, 0 }
  0x1b   : > { %p1629_p8 = scmp.ne.s32.totalorder %s2428_s5, %s1628_s20  ;;  %p1630_p9 = pneg %p1885_p7 }
  0x1c   : > { %p1635_p4 = scmp.lt.u32.totalorder %s1628_s20, %s2428_s5 }
  0x1d   : > { %p1631_p10 = pnand %p1630_p9, %p1629_p8 }
  0x1f   : > { %p1632_p2 = pneg %p1631_p10 }
  0x21   : > { %p1637_p5 = pnand %p1635_p4, %p1632_p2 }
  0x23   : > { %1640 = shalt.err (!%p1637_p5)
}
  0x24   : > { %s1641_s7 = scalar_lea.vmem %s213_s13, 128  ;;  %p1649_p11 = scmp.lt.s32.totalorder %s213_s13, %s213_s13 }
  0x25   : > { %p1642_p0 = scmp.ne.s32.totalorder %s213_s13, %s1641_s7  ;;  %p1650_p6 = scmp.lt.s32.totalorder %s1641_s7, %s1641_s7 }
  0x27   : > { %p1644_p1 = pnand %p1642_p0, %p1630_p9  ;;  %p1651_p13 = por %p1650_p6, %p1649_p11 }
  0x29   : > { %p1645_p12 = pneg %p1644_p1 }
  0x2b   : > { %p1652_p3 = pnand %p1651_p13, %p1645_p12 }
  0x2d   : > { %1655 = shalt.err (!%p1652_p3)
}
  0x2e   : > { %1529 = dma.hbm_to_vmem [thread:$0]  (!%p1885_p7), %s2428_s5, 128, %s213_s13, [#allocation6]  }
  0x2f   : > { %s1487_s20 = sshll.u32 %s1756_s24, 9  ;;  %s235_s26 = scalar_lea.vmem [#allocation2], %s1452_s17 }
  0x30   : > { %s242_s28 = sshll.u32 %s235_s26, 4  ;;  %s1916_s30 = scalar_lea.hbm %s2424_s1, %s1487_s20  ;;  %s1918_s28 = int_to_ptr.vmem [resolvable:$true] %s242_s28 }
  0x31   : > { %s1920_s14 = scalar_lea.sflag [#allocation3], %s231_s15  ;;  %s1656_s7 = scalar_lea.hbm %s1916_s30, 512 }
  0x32   : > { %p1657_p6 = scmp.ne.s32.totalorder %s1916_s30, %s1656_s7  ;;  %p2444_p11 = scmp.ne.s32.totalorder %s2443_s16, 0 }
  0x33   : > { %s1661_s18 = scalar_lea.hbm %s2424_s1, 1024  ;;  %p1662_p7 = scmp.lt.u32.totalorder %s1916_s30, %s2424_s1 }
  0x34   : > { %p1658_p12 = pneg %p2444_p11  ;;  %p1663_p3 = scmp.lt.u32.totalorder %s1661_s18, %s1656_s7 }
  0x35   : > { %p1665_p9 = scmp.lt.u32.totalorder %s1656_s7, %s1916_s30 }
  0x36   : > { %p1659_p13 = pnand %p1658_p12, %p1657_p6  ;;  %p1664_p8 = por %p1663_p3, %p1662_p7 }
  0x38   : > { %p1660_p1 = pneg %p1659_p13  ;;  %p1666_p10 = por %p1665_p9, %p1664_p8 }
  0x3a   : > { %p1667_p2 = pnand %p1666_p10, %p1660_p1 }
  0x3c   : > { %1670 = shalt.err (!%p1667_p2)
}
  0x3d   : > { %s1671_s15 = scalar_lea.vmem %s1918_s28, 512  ;;  %s1759_s26 = smov [#allocation2]  }
  0x3e   : > { %p1672_p4 = scmp.ne.s32.totalorder %s1918_s28, %s1671_s15  ;;  %s1676_s29 = sshll.u32 %s1759_s26, 4  ;;  %s1677_s29 = int_to_ptr.vmem [resolvable:$false] %s1676_s29 }
  0x3f   : > { %s1678_s12 = scalar_lea.vmem %s1677_s29, 1024  ;;  %p1679_p6 = scmp.lt.s32.totalorder %s1918_s28, %s1677_s29 }
  0x40   : > { %p1674_p5 = pnand %p1672_p4, %p1658_p12  ;;  %p1680_p13 = scmp.lt.s32.totalorder %s1678_s12, %s1671_s15 }
  0x42   : > { %p1675_p0 = pneg %p1674_p5  ;;  %p1681_p7 = por %p1680_p13, %p1679_p6 }
  0x44   : > { %p1682_p3 = pnand %p1681_p7, %p1675_p0 }
  0x46   : > { %1685 = shalt.err (!%p1682_p3)
}
  0x47   : > { %s1760_s7 = smov 128   ;;  %s1761_s13 = smov 8  }
  0x48   : > { %1533 = dma.hbm_to_vmem [thread:$0]  (!%p2444_p11), %s1916_s30, 512, %s1918_s28, %s1920_s14, %s1760_s7, %s1760_s7, %s1761_s13  }
  0x49   : > { %p2445_p12 = scmp.ne.s32.totalorder %s2440_s11, 0 }
  0x4a   : > { %s1951_s17 = sand.u32 (!%p2445_p12), 1, %s1748_s22   ;;  %p2446_p1 = scmp.ne.s32.totalorder (!%p2445_p12), %s2437_s8, 0 }
  0x4b   : > { %254 = sbr.rel (%p2445_p12) target bundleno = 1074 (0x432), region = 44  ;;  %s1456_s18 = sshll.u32 (!%p2445_p12), %s1951_s17, 5 }
  0x4c   : > { %s257_s19 = scalar_lea.sflag (!%p2445_p12), [#allocation3], %s1951_s17  ;;  %s1955_s20 = scalar_lea.vmem (!%p2445_p12), [#allocation2], %s1456_s18 }
  0x52   : > { %1731 = dma.done.wait (%p2446_p1), %s257_s19, 512  }
  0x53   : > { %1733 = vsyncadd (%p2446_p1), %s257_s19, 4294966784  ;;  %p2447_p11 = scmp.eq.s32.totalorder %s1836_s25, 0 }
  0x55   : > { %1735 = dma.done.wait (%p2447_p11), [#allocation6], 128   ;;  %p2448_p8 = pmov %p2447_p11 }
  0x56   : > { %p298_p9 = scmp.lt.s32.totalorder %s1836_s25, 1  ;;  %v1762_v0 = vmov 0   ;;  %vm355_vm0 = vcmask 1043456   ;;  %v1610_v4 = vld [vmem:[%s2425_s2] sm:$0xff]   ;;  %v1985_v6 = vld [vmem:[%s2427_s4 + $0x10] sm:$0xff]  ;;  %vm348_vm1 = vcmask 64512  }
  0x57   : > { %1737 = vsyncadd (%p2448_p8), [#allocation6], 4294967168  ;;  %394 = vmatprep.mubr.bf16.mxu0 %v1762_v0  ;;  %1594 = vset.pattern.permute.xlu0 %v1762_v0  ;;  %v1980_v5 = vld [vmem:[%s2427_s4] sm:$0xff]  ;;  %v1991_v8 = vld [vmem:[%s2427_s4 + $0x8] sm:$0xff]  ;;  %v1763_v11 = vmov 1   ;;  %v1764_v12 = vmov 2  }
  0x58   : > { %s299_s30 = scalar_select %p298_p9, %s1836_s25, 1  ;;  %1595 = vset.pattern.permute.xlu1 %v1762_v0  ;;  %949 = vmatprep.mubr.bf16.mxu1 %v1762_v0  ;;  %v1996_v9 = vld [vmem:[%s2427_s4 + $0x18] sm:$0xff]  ;;  %v1611_v10 = vld [vmem:[%s2425_s2 + $0x8] sm:$0xff]   ;;  %vm582_vm2 = vcmask 277504   ;;  %vm727_vm3 = vcmask 293888   ;;  %vm989_vm4 = vcmask 556032  }
  0x59   : > { %315 = vperm.xlu0 %1594, %v1980_v5   ;;  %325 = vperm.xlu1 %1595, %v1985_v6   ;;  %s1766_s16 = smov 36   ;;  %s1768_s14 = smov 32   ;;  %vm712_vm5 = vcmask 261120   ;;  %vm639_vm6 = vcmask 31744   ;;  %vm974_vm7 = vcmask 523264   ;;  %vm666_vm8 = vcmask 1031168  }
  0x5a   : > { %s1488_s8 = sshll.u32 %s299_s30, 3  ;;  %s1769_s15 = smov 4   ;;  %vm693_vm9 = vcmask 1014784   ;;  %vm816_vm10 = vcmask 785408  }
  0x5b   : > { %s302_s28 = scalar_lea.vmem %s2423_s0, %s1488_s8  ;;  %s1770_s26 = smov 64  }
  0x5c   : > { %v312_v1 = vld [vmem:[%s302_s28] sm:$0xff]  ;;  %s1767_s28 = smov 68   ;;  %s1771_s29 = smov 126  }
  0x5d   : > { %v1464_v2 = vcombine.high %v312_v1, %v312_v1  ;;  %v1463_v3 = vcombine.low %v312_v1, %v312_v1  ;;  %320 = vperm.xlu0 %1594, %v1991_v8   ;;  %330 = vperm.xlu1 %1595, %v1996_v9   ;;  %s1772_s12 = smov 124   ;;  %s1773_s7 = smov 96  }
  0x5e   : > { %s1340_s30 = scalar_lea.sflag [#allocation4], %s1951_s17  ;;  %p2449_p2 = scmp.ne.s32.totalorder %s2438_s9, 0 }
  0x5f   : > { %1465 = vmatprep.subr.msk.bf16.mxu0 %vm355_vm0, %v1464_v2  ;;  %v357_v7 = vsel %vm355_vm0, %v1463_v3, 0  ;;  %s1777_s11 = smov [#allocation7]  }
  0x60   : > { %363 = vmatpush1.bf16.msra.mxu0 %v357_v7 }
  0x61   : > { %1596 = vset.pattern.permute.xlu0 %v1763_v11  ;;  %1597 = vset.pattern.permute.xlu1 %v1763_v11 }
  0x62   : > { %491 = vperm.xlu0 %1596, %v1980_v5   ;;  %495 = vperm.xlu1 %1597, %v1991_v8  }
  0x63   : > { %1466 = vmatmul.mubr.msk.bf16.vlgmr.msra.gmra.mrb[0].mxu0 %vm348_vm1, %v1610_v4 }
  0x64   : > { %404 = vmatprep.mubr.bf16.mxu0 %v1762_v0 }
  0x66   : > { %1599 = vset.pattern.permute.xlu0 %v1764_v12  ;;  %1598 = vset.pattern.permute.xlu1 %v1764_v12 }
  0x67   : > { %519 = vperm.xlu0 %1599, %v1991_v8   ;;  %515 = vperm.xlu1 %1598, %v1980_v5  }
  0x6b   : > { %1467 = vmatmul.mubr.msk.bf16.gmra.mrb[4].mxu0 %vm348_vm1, %v1611_v10  ;;  %523 = vperm.xlu0 %1599, %v1985_v6  }
  0x6c   : > { %880 = vmatprep.mubr.bf16.mxu0 %v1762_v0  ;;  %1600 = vset.pattern.permute.xlu1 %v1763_v11 }
  0x6d   : > { %499 = vperm.xlu1 %1600, %v1985_v6  }
  0x71   : > { %503 = vperm.xlu1 %1600, %v1996_v9  }
  0x75   : > { %1601 = vset.pattern.permute.xlu1 %v1764_v12 }
  0x76   : > { %527 = vperm.xlu1 %1601, %v1996_v9  }
  0xd8   : > { %v316_v13 = vpop.permute.xlu0 %315  ;;  %v326_v22 = vpop.permute.xlu1 %325 }
  0xdc   : > { %v321_v15 = vpop.permute.xlu0 %320  ;;  %v331_v35 = vpop.permute.xlu1 %330 }
 0x136   : > { %v396_v14 = vpop.f32.mrb[0].mxu0 }
 0x137   : > { %v2016_v16 = vadd.f32 %v396_v14, %v316_v13  ;;  %v398_v17 = vpop.f32.mrb[1].mxu0  ;;  %v496_v14 = vpop.permute.xlu1 %495 }
 0x138   : > { %v2018_v18 = vadd.f32 %v398_v17, %v316_v13  ;;  %v400_v19 = vpop.f32.mrb[2].mxu0 }
 0x139   : > { %v2020_v20 = vadd.f32 %v400_v19, %v321_v15  ;;  %v402_v21 = vpop.f32.mrb[3].mxu0  ;;  %v436_v24 = vmul.f32 %v2016_v16, %v2016_v16 }
 0x13a   : > { %v2022_v23 = vadd.f32 %v402_v21, %v321_v15  ;;  %v437_v27 = vmul.f32 %v2018_v18, %v2018_v18 }
 0x13b   : > { %v415_v25 = vadd.f32 %v2020_v20, %v2016_v16  ;;  %v438_v26 = vmul.f32 %v2020_v20, %v2020_v20 }
 0x13c   : > { %v424_v28 = vadd.f32 %v2022_v23, %v2018_v18  ;;  %v439_v29 = vmul.f32 %v2022_v23, %v2022_v23 }
 0x13d   : > { %v444_v30 = vadd.f32 %v438_v26, %v436_v24 }
 0x13e   : > { %v453_v31 = vadd.f32 %v439_v29, %v437_v27  ;;  %v406_v32 = vpop.f32.mrb[4].mxu0 }
 0x13f   : > { %v2036_v33 = vadd.f32 %v406_v32, %v326_v22  ;;  %v408_v34 = vpop.f32.mrb[5].mxu0 }
 0x140   : > { %v2038_v36 = vadd.f32 %v408_v34, %v326_v22  ;;  %v410_v37 = vpop.f32.mrb[6].mxu0 }
 0x141   : > { %v416_v38 = vadd.f32 %v415_v25, %v2036_v33  ;;  %v440_v39 = vmul.f32 %v2036_v33, %v2036_v33  ;;  %v2043_v40 = vadd.f32 %v410_v37, %v331_v35  ;;  %v412_v41 = vpop.f32.mrb[7].mxu0 }
 0x142   : > { %v425_v42 = vadd.f32 %v424_v28, %v2038_v36  ;;  %v441_v43 = vmul.f32 %v2038_v36, %v2038_v36  ;;  %v2048_v44 = vadd.f32 %v412_v41, %v331_v35  ;;  %v516_v35 = vpop.permute.xlu1 %515 }
 0x143   : > { %v445_v45 = vadd.f32 %v444_v30, %v440_v39  ;;  %v417_v46 = vadd.f32 %v416_v38, %v2043_v40  ;;  %v442_v47 = vmul.f32 %v2043_v40, %v2043_v40 }
 0x144   : > { %v454_v48 = vadd.f32 %v453_v31, %v441_v43  ;;  %v426_v49 = vadd.f32 %v425_v42, %v2048_v44  ;;  %v443_v50 = vmul.f32 %v2048_v44, %v2048_v44 }
 0x145   : > { %v418_v51 = vrot.slane %v417_v46, 4  ;;  %v446_v52 = vadd.f32 %v445_v45, %v442_v47  ;;  %v492_v45 = vpop.permute.xlu0 %491 }
 0x146   : > { %v427_v53 = vrot.slane %v426_v49, 4  ;;  %v455_v54 = vadd.f32 %v454_v48, %v443_v50  ;;  %v549_v48 = vld [vmem:[%s1955_s20 + $0x18] sm:$0xff] }
 0x147   : > { %v419_v55 = vadd.f32 %v418_v51, %v417_v46  ;;  %v447_v56 = vrot.slane %v446_v52, 4  ;;  %v547_v46 = vld [vmem:[%s1955_s20 + $0x8] sm:$0xff]  ;;  %v556_v51 = vunpack.c.l.bf16 %v549_v48 }
 0x148   : > { %v428_v57 = vadd.f32 %v427_v53, %v426_v49  ;;  %v456_v58 = vrot.slane %v455_v54, 4  ;;  %v546_v49 = vld [vmem:[%s1955_s20] sm:$0xff]  ;;  %v552_v50 = vunpack.c.l.bf16 %v547_v46 }
 0x149   : > { %v420_v59 = vrot.slane %v419_v55, 2  ;;  %v448_v60 = vadd.f32 %v447_v56, %v446_v52  ;;  %v520_v47 = vpop.permute.xlu0 %519  ;;  %v557_v52 = vunpack.c.h.bf16 %v549_v48  ;;  %v551_v56 = vunpack.c.h.bf16 %v546_v49 }
 0x14a   : > { %v429_v61 = vrot.slane %v428_v57, 2  ;;  %v457_v62 = vadd.f32 %v456_v58, %v455_v54 }
 0x14b   : > { %v421_v63 = vadd.f32 %v420_v59, %v419_v55  ;;  %v449_v1 = vrot.slane %v448_v60, 2  ;;  %v550_v55 = vunpack.c.l.bf16 %v546_v49 }
 0x14c   : > { %v430_v2 = vadd.f32 %v429_v61, %v428_v57  ;;  %v458_v3 = vrot.slane %v457_v62, 2  ;;  %v610_v57 = vlaneseq }
 0x14d   : > { %v422_v4 = vrot.slane %v421_v63, 1  ;;  %v450_v7 = vadd.f32 %v449_v1, %v448_v60 }
 0x14e   : > { %v431_v10 = vrot.slane %v430_v2, 1  ;;  %v459_v11 = vadd.f32 %v458_v3, %v457_v62 }
 0x14f   : > { %v423_v12 = vadd.f32 %v422_v4, %v421_v63  ;;  %v451_v13 = vrot.slane %v450_v7, 1 }
 0x150   : > { %v432_v15 = vadd.f32 %v431_v10, %v430_v2  ;;  %v460_v17 = vrot.slane %v459_v11, 1 }
 0x151   : > { %v434_v19 = vmul.f32 0.03125, %v423_v12  ;;  %v452_v21 = vadd.f32 %v451_v13, %v450_v7  ;;  %v524_v7 = vpop.permute.xlu0 %523 }
 0x152   : > { %v435_v22 = vmul.f32 0.03125, %v432_v15  ;;  %v461_v24 = vadd.f32 %v460_v17, %v459_v11 }
 0x153   : > { %v462_v25 = vmul.f32 0.03125, %v452_v21  ;;  %v464_v26 = vmul.f32 %v434_v19, %v434_v19  ;;  %v480_v27 = vsub.f32 %v2043_v40, %v434_v19  ;;  %v476_v28 = vsub.f32 %v2020_v20, %v434_v19 }
 0x154   : > { %v463_v29 = vmul.f32 0.03125, %v461_v24  ;;  %v465_v30 = vmul.f32 %v435_v22, %v435_v22  ;;  %v481_v31 = vsub.f32 %v2048_v44, %v435_v22  ;;  %v477_v32 = vsub.f32 %v2022_v23, %v435_v22  ;;  %v500_v23 = vpop.permute.xlu1 %499 }
 0x155   : > { %v466_v34 = vsub.f32 %v462_v25, %v464_v26  ;;  %v478_v37 = vsub.f32 %v2036_v33, %v434_v19  ;;  %v479_v38 = vsub.f32 %v2038_v36, %v435_v22  ;;  %v474_v39 = vsub.f32 %v2016_v16, %v434_v19  ;;  %v548_v36 = vld [vmem:[%s1955_s20 + $0x10] sm:$0xff]  ;;  %s1765_s20 = smov 34  }
 0x156   : > { %v467_v40 = vsub.f32 %v463_v29, %v465_v30  ;;  %v475_v20 = vsub.f32 %v2018_v18, %v435_v22  ;;  %v553_v16 = vunpack.c.h.bf16 %v547_v46  ;;  %v554_v53 = vunpack.c.l.bf16 %v548_v36 }
 0x157   : > { %v468_v41 = vmax.f32 %v466_v34, 0.0  ;;  %v555_v54 = vunpack.c.h.bf16 %v548_v36 }
 0x158   : > { %v469_v42 = vmax.f32 %v467_v40, 0.0  ;;  %v504_v33 = vpop.permute.xlu1 %503 }
 0x159   : > { %v470_v43 = vadd.f32 1e-06, %v468_v41 }
 0x15a   : > { %v471_v44 = vadd.f32 1e-06, %v469_v42 }
 0x15b   : > { %1620 = vrsqrt.f32 %v470_v43  ;;  %v611_v43 = vshrl.u32 %v610_v57, 7 }
 0x15c   : > { %1622 = vrsqrt.f32 %v471_v44  ;;  %v528_v4 = vpop.permute.xlu1 %527 }
 0x15d   : > { %v612_v57 = vsub.s32 0, %v611_v43 }
 0x165   : > { %v1621_v18 = vpop.eup %1620 }
 0x166   : > { %v1623_v58 = vpop.eup %1622  ;;  %v484_v59 = vmul.f32 %v1621_v18, %v476_v28  ;;  %v486_v60 = vmul.f32 %v1621_v18, %v478_v37  ;;  %v482_v61 = vmul.f32 %v1621_v18, %v474_v39  ;;  %v488_v62 = vmul.f32 %v1621_v18, %v480_v27 }
 0x167   : > { %v485_v63 = vmul.f32 %v1623_v58, %v477_v32  ;;  %v487_v1 = vmul.f32 %v1623_v58, %v479_v38  ;;  %v483_v2 = vmul.f32 %v1623_v58, %v475_v20  ;;  %v489_v3 = vmul.f32 %v1623_v58, %v481_v31 }
 0x168   : > { %v508_v10 = vmul.f32 %v496_v14, %v484_v59  ;;  %v510_v11 = vmul.f32 %v500_v23, %v486_v60  ;;  %v506_v12 = vmul.f32 %v492_v45, %v482_v61  ;;  %v512_v13 = vmul.f32 %v504_v33, %v488_v62 }
 0x169   : > { %v509_v15 = vmul.f32 %v496_v14, %v485_v63  ;;  %v511_v17 = vmul.f32 %v500_v23, %v487_v1  ;;  %v507_v19 = vmul.f32 %v492_v45, %v483_v2  ;;  %v513_v21 = vmul.f32 %v504_v33, %v489_v3  ;;  %v601_v14 = vld [vmem:[#allocation5] sm:$0xff] }
 0x16a   : > { %v2068_v22 = vadd.f32 %v516_v35, %v506_v12  ;;  %v2070_v24 = vadd.f32 %v520_v47, %v508_v10  ;;  %v2072_v25 = vadd.f32 %v528_v4, %v512_v13  ;;  %v2074_v26 = vadd.f32 %v524_v7, %v510_v11 }
 0x16b   : > { %v2076_v27 = vadd.f32 %v516_v35, %v507_v19  ;;  %v2078_v28 = vadd.f32 %v520_v47, %v509_v15  ;;  %v2080_v29 = vadd.f32 %v528_v4, %v513_v21  ;;  %v2082_v30 = vadd.f32 %v524_v7, %v511_v17 }
 0x16c   : > { %v538_v31 = vmax.f32 %v2068_v22, 0.0  ;;  %v540_v32 = vmax.f32 %v2070_v24, 0.0  ;;  %v544_v34 = vmax.f32 %v2072_v25, 0.0  ;;  %v542_v37 = vmax.f32 %v2074_v26, 0.0 }
 0x16d   : > { %v539_v38 = vmax.f32 %v2076_v27, 0.0  ;;  %v541_v35 = vmax.f32 %v2078_v28, 0.0  ;;  %v545_v39 = vmax.f32 %v2080_v29, 0.0  ;;  %v543_v40 = vmax.f32 %v2082_v30, 0.0 }
 0x16e   : > { %v560_v20 = vadd.f32 %v552_v50, %v540_v32  ;;  %v558_v41 = vadd.f32 %v550_v55, %v538_v31  ;;  %v1468_v42 = vcombine.low %v601_v14, %v601_v14  ;;  %v1469_v45 = vcombine.high %v601_v14, %v601_v14 }
 0x16f   : > { %v561_v44 = vadd.f32 %v553_v16, %v541_v35  ;;  %v559_v23 = vadd.f32 %v551_v56, %v539_v38  ;;  %v564_v46 = vadd.f32 %v556_v51, %v544_v34  ;;  %v562_v33 = vadd.f32 %v554_v53, %v542_v37 }
 0x170   : > { %v566_v47 = vpack.c.bf16 %v560_v20, %v558_v41  ;;  %v565_v48 = vadd.f32 %v557_v52, %v545_v39  ;;  %v563_v36 = vadd.f32 %v555_v54, %v543_v40  ;;  %v608_v50 = vpack.i.b16 %v1468_v42, %v1468_v42 }
 0x171   : > { %v567_v49 = vpack.c.bf16 %v561_v44, %v559_v23  ;;  %v627_v16 = vsub.s32 1, %v611_v43  ;;  %v615_v18 = vpack.i.b16 %v1469_v45, %v1469_v45  ;;  %v568_v55 = vpack.c.bf16 %v564_v46, %v562_v33 }
 0x172   : > { %574 = vrot.lane.b32.xlu0 %v566_v47, %s1765_s20  ;;  %v569_v56 = vpack.c.bf16 %v565_v48, %v563_v36  ;;  %v613_v52 = vrot.slane %v608_v50, %v612_v57 }
 0x173   : > { %576 = vrot.lane.b32.xlu1 %v567_v49, %s1765_s20  ;;  %v628_v51 = vrot.slane %v608_v50, %v627_v16  ;;  %v632_v53 = vrot.slane %v615_v18, %v627_v16  ;;  %v620_v54 = vrot.slane %v615_v18, %v612_v57 }
 0x176   : > { %578 = vrot.lane.b32.xlu0 %v568_v55, %s1765_s20 }
 0x177   : > { %580 = vrot.lane.b32.xlu1 %v569_v56, %s1765_s20  ;;  %s1690_s20 = sshll.u32 %s1777_s11, 4  ;;  %s1691_s20 = int_to_ptr.vmem [resolvable:$false] %s1690_s20 }
 0x17a   : > { %723 = vrot.lane.b32.xlu0 %v628_v51, %s1766_s16 }
 0x17b   : > { %725 = vrot.lane.b32.xlu1 %v632_v53, %s1766_s16  ;;  %s1692_s16 = scalar_lea.vmem %s1691_s20, 2048 }
 0x17e   : > { %985 = vrot.lane.b32.xlu0 %v628_v51, %s1767_s28 }
 0x17f   : > { %987 = vrot.lane.b32.xlu1 %v632_v53, %s1767_s28 }
 0x182   : > { %708 = vrot.lane.b32.xlu0 %v613_v52, %s1768_s14 }
 0x183   : > { %710 = vrot.lane.b32.xlu1 %v620_v54, %s1768_s14 }
 0x186   : > { %637 = vrot.lane.b32.xlu0 %v632_v53, %s1769_s15 }
 0x187   : > { %635 = vrot.lane.b32.xlu1 %v628_v51, %s1769_s15 }
 0x18a   : > { %970 = vrot.lane.b32.xlu0 %v613_v52, %s1770_s26 }
 0x18b   : > { %972 = vrot.lane.b32.xlu1 %v620_v54, %s1770_s26 }
 0x1e4   : > { %v575_v58 = vpop.permute.xlu0 %574 }
 0x1e5   : > { %v590_v59 = vsel %vm582_vm2, 0, %v575_v58  ;;  %v577_v60 = vpop.permute.xlu1 %576 }
 0x1e6   : > { %v2112_v61 = vsel %vm582_vm2, %v575_v58, %v577_v60  ;;  %654 = vrot.lane.b32.xlu0 %v590_v59, %s1771_s29  ;;  %v621_v1 = vmul.bf16 %v613_v52, %v590_v59  ;;  %v2129_v15 = vsel %vm582_vm2, %v577_v60, 0 }
 0x1e7   : > { %v622_v62 = vmul.bf16 %v620_v54, %v2112_v61 }
 0x1e8   : > { %v579_v63 = vpop.permute.xlu0 %578 }
 0x1e9   : > { %v2116_v2 = vsel %vm582_vm2, 0, %v579_v63  ;;  %v581_v3 = vpop.permute.xlu1 %580  ;;  %917 = vmatprep.subr.bf16.mxu1 %v622_v62 }
 0x1ea   : > { %v2119_v4 = vsel %vm582_vm2, %v579_v63, %v581_v3  ;;  %656 = vrot.lane.b32.xlu0 %v2112_v61, %s1771_s29  ;;  %918 = vmatpush1.bf16.msra.mxu1 %v621_v1  ;;  %v623_v11 = vmul.bf16 %v613_v52, %v2116_v2  ;;  %v2126_v12 = vsel %vm582_vm2, %v581_v3, 0 }
 0x1eb   : > { %660 = vrot.lane.b32.xlu1 %v2116_v2, %s1771_s29  ;;  %v624_v7 = vmul.bf16 %v620_v54, %v2119_v4 }
 0x1ec   : > { %v724_v10 = vpop.permute.xlu0 %723 }
 0x1ed   : > { %v726_v13 = vpop.permute.xlu1 %725  ;;  %919 = vmatprep.subr.bf16.mxu1 %v624_v7  ;;  %v732_v17 = vmul.bf16 %v724_v10, %v590_v59  ;;  %v735_v41 = vmul.bf16 %v724_v10, %v2116_v2 }
 0x1ee   : > { %664 = vrot.lane.b32.xlu0 %v2126_v12, %s1771_s29  ;;  %920 = vmatpush1.bf16.msra.mxu1 %v623_v11  ;;  %v728_v23 = vsel %vm727_vm3, %v724_v10, %v726_v13  ;;  %v737_v50 = vmul.bf16 %v726_v13, %v2126_v12  ;;  %v734_v16 = vmul.bf16 %v726_v13, %v2129_v15 }
 0x1ef   : > { %658 = vrot.lane.b32.xlu1 %v2129_v15, %s1771_s29  ;;  %v733_v46 = vmul.bf16 %v728_v23, %v2112_v61  ;;  %v736_v56 = vmul.bf16 %v728_v23, %v2119_v4 }
 0x1f0   : > { %v986_v19 = vpop.permute.xlu0 %985 }
 0x1f1   : > { %v988_v21 = vpop.permute.xlu1 %987  ;;  %v994_v14 = vmul.bf16 %v986_v19, %v590_v59  ;;  %v997_v45 = vmul.bf16 %v986_v19, %v2116_v2 }
 0x1f2   : > { %744 = vrot.lane.b32.xlu0 %v732_v17, %s1772_s12  ;;  %v990_v18 = vsel %vm989_vm4, %v986_v19, %v988_v21  ;;  %v999_v51 = vmul.bf16 %v988_v21, %v2126_v12  ;;  %v996_v54 = vmul.bf16 %v988_v21, %v2129_v15 }
 0x1f3   : > { %662 = vrot.lane.b32.xlu1 %v2119_v4, %s1771_s29  ;;  %v995_v55 = vmul.bf16 %v990_v18, %v2112_v61  ;;  %s1458_s29 = sshll.u32 %s1951_s17, 6 }
 0x1f4   : > { %v709_v20 = vpop.permute.xlu0 %708 }
 0x1f5   : > { %v717_v42 = vmul.bf16 %v709_v20, %v590_v59  ;;  %v711_v43 = vpop.permute.xlu1 %710  ;;  %v720_v33 = vmul.bf16 %v709_v20, %v2116_v2 }
 0x1f6   : > { %1006 = vrot.lane.b32.xlu0 %v994_v14, %s1772_s12  ;;  %v713_v53 = vsel %vm712_vm5, %v709_v20, %v711_v43  ;;  %v722_v58 = vmul.bf16 %v711_v43, %v2126_v12  ;;  %v719_v62 = vmul.bf16 %v711_v43, %v2129_v15 }
 0x1f7   : > { %750 = vrot.lane.b32.xlu1 %v735_v41, %s1772_s12  ;;  %v718_v52 = vmul.bf16 %v713_v53, %v2112_v61  ;;  %v721_v3 = vmul.bf16 %v713_v53, %v2119_v4 }
 0x1f8   : > { %v638_v44 = vpop.permute.xlu0 %637 }
 0x1f9   : > { %v636_v48 = vpop.permute.xlu1 %635  ;;  %v646_v60 = vmul.bf16 %v638_v44, %v2129_v15  ;;  %v649_v63 = vmul.bf16 %v638_v44, %v2126_v12 }
 0x1fa   : > { %780 = vrot.lane.b32.xlu0 %v717_v42, %s1773_s7  ;;  %v644_v49 = vmul.bf16 %v636_v48, %v590_v59  ;;  %v647_v57 = vmul.bf16 %v636_v48, %v2116_v2  ;;  %v640_v7 = vsel %vm639_vm6, %v636_v48, %v638_v44 }
 0x1fb   : > { %1012 = vrot.lane.b32.xlu1 %v997_v45, %s1772_s12  ;;  %v645_v11 = vmul.bf16 %v640_v7, %v2112_v61  ;;  %v648_v17 = vmul.bf16 %v640_v7, %v2119_v4 }
 0x1fc   : > { %v2143_v47 = vpop.permute.xlu0 %970 }
 0x1fd   : > { %v979_v36 = vmul.bf16 %v2143_v47, %v590_v59  ;;  %v998_v59 = vmul.bf16 %v990_v18, %v2119_v4  ;;  %v973_v1 = vpop.permute.xlu1 %972 }
 0x1fe   : > { %746 = vrot.lane.b32.xlu0 %v733_v46, %s1772_s12  ;;  %v981_v10 = vmul.bf16 %v973_v1, %v2129_v15  ;;  %v984_v13 = vmul.bf16 %v973_v1, %v2126_v12  ;;  %v975_v19 = vsel %vm974_vm7, %v2143_v47, %v973_v1 }
 0x1ff   : > { %786 = vrot.lane.b32.xlu1 %v720_v33, %s1773_s7  ;;  %v980_v15 = vmul.bf16 %v975_v19, %v2112_v61  ;;  %v983_v21 = vmul.bf16 %v975_v19, %v2119_v4 }
 0x202   : > { %1042 = vrot.lane.b32.xlu0 %v979_v36, %s1770_s26 }
 0x203   : > { %681 = vrot.lane.b32.xlu1 %v644_v49, %s1772_s12 }
 0x206   : > { %754 = vrot.lane.b32.xlu0 %v737_v50, %s1772_s12 }
 0x207   : > { %748 = vrot.lane.b32.xlu1 %v734_v16, %s1772_s12 }
 0x20a   : > { %1008 = vrot.lane.b32.xlu0 %v995_v55, %s1772_s12 }
 0x20b   : > { %752 = vrot.lane.b32.xlu1 %v736_v56, %s1772_s12 }
 0x20e   : > { %1016 = vrot.lane.b32.xlu0 %v999_v51, %s1772_s12 }
 0x20f   : > { %687 = vrot.lane.b32.xlu1 %v647_v57, %s1772_s12 }
 0x212   : > { %782 = vrot.lane.b32.xlu0 %v718_v52, %s1773_s7 }
 0x213   : > { %1010 = vrot.lane.b32.xlu1 %v996_v54, %s1772_s12 }
 0x216   : > { %790 = vrot.lane.b32.xlu0 %v722_v58, %s1773_s7 }
 0x217   : > { %1014 = vrot.lane.b32.xlu1 %v998_v59, %s1772_s12  ;;  %v982_v59 = vmul.bf16 %v2143_v47, %v2116_v2 }
 0x21a   : > { %685 = vrot.lane.b32.xlu0 %v646_v60, %s1772_s12 }
 0x21b   : > { %784 = vrot.lane.b32.xlu1 %v719_v62, %s1773_s7 }
 0x21e   : > { %691 = vrot.lane.b32.xlu0 %v649_v63, %s1772_s12 }
 0x21f   : > { %788 = vrot.lane.b32.xlu1 %v721_v3, %s1773_s7 }
 0x222   : > { %1046 = vrot.lane.b32.xlu0 %v981_v10, %s1770_s26 }
 0x223   : > { %683 = vrot.lane.b32.xlu1 %v645_v11, %s1772_s12 }
 0x226   : > { %1052 = vrot.lane.b32.xlu0 %v984_v13, %s1770_s26 }
 0x227   : > { %689 = vrot.lane.b32.xlu1 %v648_v17, %s1772_s12  ;;  %s1489_s12 = sshll.u32 %s1836_s25, 10 }
 0x228   : > { %s2369_s19 = scalar_lea.hbm %s2429_s6, %s1489_s12 }
 0x22b   : > { %1044 = vrot.lane.b32.xlu1 %v980_v15, %s1770_s26 }
 0x22f   : > { %1050 = vrot.lane.b32.xlu1 %v983_v21, %s1770_s26 }
 0x258   : > { %v655_v14 = vpop.permute.xlu0 %654 }
 0x25c   : > { %v657_v20 = vpop.permute.xlu0 %656 }
 0x25d   : > { %v661_v12 = vpop.permute.xlu1 %660  ;;  %v667_v44 = vsel %vm666_vm8, %v655_v14, %v657_v20 }
 0x260   : > { %v665_v41 = vpop.permute.xlu0 %664 }
 0x261   : > { %v659_v42 = vpop.permute.xlu1 %658  ;;  %802 = vrot.lane.b32.xlu0 %v665_v41, %s1773_s7 }
 0x262   : > { %796 = vrot.lane.b32.xlu1 %v659_v42, %s1773_s7  ;;  %v668_v43 = vsel %vm666_vm8, %v657_v20, %v659_v42 }
 0x263   : > { %921 = vmatprep.subr.bf16.mxu1 %v668_v43 }
 0x264   : > { %922 = vmatpush1.bf16.msra.mxu1 %v667_v44  ;;  %v745_v61 = vpop.permute.xlu0 %744 }
 0x265   : > { %v663_v23 = vpop.permute.xlu1 %662  ;;  %794 = vrot.lane.b32.xlu0 %v668_v43, %s1773_s7 }
 0x266   : > { %v670_v4 = vsel %vm666_vm8, %v663_v23, %v665_v41  ;;  %v669_v45 = vsel %vm666_vm8, %v661_v12, %v663_v23 }
 0x267   : > { %800 = vrot.lane.b32.xlu1 %v670_v4, %s1773_s7  ;;  %923 = vmatprep.subr.bf16.mxu1 %v670_v4 }
 0x268   : > { %924 = vmatpush1.bf16.msra.mxu1 %v669_v45  ;;  %v2196_v46 = vpop.permute.xlu0 %1006 }
 0x269   : > { %v751_v33 = vpop.permute.xlu1 %750  ;;  %792 = vrot.lane.b32.xlu0 %v667_v44, %s1773_s7 }
 0x26b   : > { %798 = vrot.lane.b32.xlu1 %v669_v45, %s1773_s7 }
 0x26c   : > { %v781_v48 = vpop.permute.xlu0 %780 }
 0x26d   : > { %v2200_v36 = vpop.permute.xlu1 %1012 }
 0x270   : > { %v747_v49 = vpop.permute.xlu0 %746 }
 0x271   : > { %v787_v50 = vpop.permute.xlu1 %786  ;;  %v756_v58 = vsel %vm693_vm9, %v745_v61, %v747_v49 }
 0x274   : > { %v2202_v16 = vpop.permute.xlu0 %1042 }
 0x275   : > { %v682_v18 = vpop.permute.xlu1 %681 }
 0x278   : > { %v755_v55 = vpop.permute.xlu0 %754 }
 0x279   : > { %v749_v56 = vpop.permute.xlu1 %748  ;;  %814 = vrot.lane.b32.xlu0 %v755_v55, %s1773_s7 }
 0x27a   : > { %808 = vrot.lane.b32.xlu1 %v749_v56, %s1773_s7  ;;  %v757_v53 = vsel %vm693_vm9, %v747_v49, %v749_v56  ;;  %v1776_v56 = vmov 5  }
 0x27c   : > { %v1009_v51 = vpop.permute.xlu0 %1008 }
 0x27d   : > { %v753_v57 = vpop.permute.xlu1 %752  ;;  %806 = vrot.lane.b32.xlu0 %v757_v53, %s1773_s7 }
 0x27e   : > { %v759_v52 = vsel %vm693_vm9, %v753_v57, %v755_v55  ;;  %v758_v63 = vsel %vm693_vm9, %v751_v33, %v753_v57  ;;  %v1614_v33 = vld [vmem:[%s2426_s3] sm:$0xff]   ;;  %v1775_v55 = vmov 4  }
 0x27f   : > { %812 = vrot.lane.b32.xlu1 %v759_v52, %s1773_s7 }
 0x280   : > { %v1017_v54 = vpop.permute.xlu0 %1016 }
 0x281   : > { %v688_v60 = vpop.permute.xlu1 %687  ;;  %804 = vrot.lane.b32.xlu0 %v756_v58, %s1773_s7 }
 0x283   : > { %1048 = vrot.lane.b32.xlu1 %v982_v59, %s1770_s26 }
 0x284   : > { %v783_v62 = vpop.permute.xlu0 %782 }
 0x285   : > { %v1011_v1 = vpop.permute.xlu1 %1010  ;;  %810 = vrot.lane.b32.xlu0 %v758_v63, %s1773_s7  ;;  %v817_v10 = vsel %vm816_vm10, %v781_v48, %v783_v62  ;;  %s297_s7 = scalar_lea.vmem [#allocation7], %s1458_s29 }
 0x286   : > { %v1019_v15 = vsel %vm693_vm9, %v1009_v51, %v1011_v1  ;;  %s1353_s13 = sshll.u32 %s297_s7, 4  ;;  %s2371_s13 = int_to_ptr.vmem [resolvable:$true] %s1353_s13 }
 0x287   : > { %1058 = vrot.lane.b32.xlu1 %v659_v42, %s1770_s26  ;;  %v1774_v42 = vmov 3   ;;  %s1686_s8 = scalar_lea.vmem %s2371_s13, 1024  ;;  %p1693_p0 = scmp.lt.s32.totalorder %s2371_s13, %s1691_s20 }
 0x288   : > { %v791_v7 = vpop.permute.xlu0 %790  ;;  %1603 = vset.pattern.permute.xlu1 %v1774_v42  ;;  %1602 = vset.pattern.permute.xlu0 %v1774_v42  ;;  %p1687_p10 = scmp.ne.s32.totalorder %s2371_s13, %s1686_s8  ;;  %p1694_p6 = scmp.lt.s32.totalorder %s1692_s16, %s1686_s8 }
 0x289   : > { %v1015_v3 = vpop.permute.xlu1 %1014  ;;  %1056 = vrot.lane.b32.xlu0 %v668_v43, %s1770_s26  ;;  %v1018_v43 = vsel %vm693_vm9, %v2196_v46, %v1009_v51 }
 0x28a   : > { %v1021_v20 = vsel %vm693_vm9, %v1015_v3, %v1017_v54  ;;  %v1020_v61 = vsel %vm693_vm9, %v2200_v36, %v1015_v3  ;;  %p1688_p4 = pnand %p1687_p10, %p2449_p2  ;;  %p1695_p13 = por %p1694_p6, %p1693_p0 }
 0x28b   : > { %1062 = vrot.lane.b32.xlu1 %v670_v4, %s1770_s26 }
 0x28c   : > { %v686_v11 = vpop.permute.xlu0 %685  ;;  %p1689_p5 = pneg %p1688_p4 }
 0x28d   : > { %v785_v2 = vpop.permute.xlu1 %784  ;;  %1054 = vrot.lane.b32.xlu0 %v667_v44, %s1770_s26 }
 0x28e   : > { %v818_v47 = vsel %vm816_vm10, %v783_v62, %v785_v2  ;;  %p1696_p7 = pnand %p1695_p13, %p1689_p5 }
 0x28f   : > { %1060 = vrot.lane.b32.xlu1 %v669_v45, %s1770_s26  ;;  %848 = vmatprep.subr.bf16.mxu0 %v818_v47 }
 0x290   : > { %849 = vmatpush1.bf16.msra.mxu0 %v817_v10  ;;  %v692_v21 = vpop.permute.xlu0 %691 }
 0x291   : > { %v789_v13 = vpop.permute.xlu1 %788  ;;  %1064 = vrot.lane.b32.xlu0 %v665_v41, %s1770_s26 }
 0x292   : > { %v819_v17 = vsel %vm816_vm10, %v787_v50, %v789_v13  ;;  %v820_v19 = vsel %vm816_vm10, %v789_v13, %v791_v7 }
 0x293   : > { %1070 = vrot.lane.b32.xlu1 %v1011_v1, %s1770_s26  ;;  %850 = vmatprep.subr.bf16.mxu0 %v820_v19 }
 0x294   : > { %851 = vmatpush1.bf16.msra.mxu0 %v819_v17  ;;  %v1047_v45 = vpop.permute.xlu0 %1046  ;;  %v1615_v17 = vld [vmem:[%s2426_s3 + $0x10] sm:$0xff]  }
 0x295   : > { %v684_v14 = vpop.permute.xlu1 %683  ;;  %1068 = vrot.lane.b32.xlu0 %v1019_v15, %s1770_s26 }
 0x296   : > { %v695_v12 = vsel %vm693_vm9, %v684_v14, %v686_v11  ;;  %v694_v41 = vsel %vm693_vm9, %v682_v18, %v684_v14 }
 0x297   : > { %1074 = vrot.lane.b32.xlu1 %v1021_v20, %s1770_s26  ;;  %925 = vmatprep.subr.bf16.mxu1 %v695_v12 }
 0x298   : > { %926 = vmatpush1.bf16.msra.mxu1 %v694_v41  ;;  %v1053_v49 = vpop.permute.xlu0 %1052  ;;  %v1617_v41 = vld [vmem:[%s2426_s3 + $0x18] sm:$0xff]  }
 0x299   : > { %v690_v44 = vpop.permute.xlu1 %689  ;;  %1066 = vrot.lane.b32.xlu0 %v1018_v43, %s1770_s26 }
 0x29a   : > { %v697_v23 = vsel %vm693_vm9, %v690_v44, %v692_v21  ;;  %v696_v4 = vsel %vm693_vm9, %v688_v60, %v690_v44 }
 0x29b   : > { %1072 = vrot.lane.b32.xlu1 %v1020_v61, %s1770_s26  ;;  %927 = vmatprep.subr.bf16.mxu1 %v697_v23 }
 0x29c   : > { %928 = vmatpush1.bf16.msra.mxu1 %v696_v4 }
 0x29d   : > { %v1045_v46 = vpop.permute.xlu1 %1044  ;;  %1076 = vrot.lane.b32.xlu0 %v1017_v54, %s1770_s26 }
 0x29e   : > { %v2248_v48 = vsel %vm974_vm7, %v2202_v16, %v1045_v46  ;;  %v1079_v36 = vsel %vm974_vm7, %v1045_v46, %v1047_v45  ;;  %v1616_v16 = vld [vmem:[%s2426_s3 + $0x8] sm:$0xff]  }
 0x29f   : > { %1490 = vmatprep.subr.bf16.mxu1 %v1079_v36  ;;  %1476 = vmatmul.mubr.msk.bf16.vlgmr.msra.gmra.mrb[0].mxu1 %vm816_vm10, %v1614_v33 }
 0x2a0   : > { %1496 = vmatpush1.bf16.msra.mxu1 %v2248_v48  ;;  %959 = vmatprep.mubr.bf16.mxu1 %v1762_v0 }
 0x2a1   : > { %v1051_v50 = vpop.permute.xlu1 %1050  ;;  %1174 = vperm.xlu1 %1603, %v1991_v8   ;;  %1170 = vperm.xlu0 %1602, %v1980_v5  }
 0x2a2   : > { %v1081_v18 = vsel %vm974_vm7, %v1051_v50, %v1053_v49 }
 0x2a3   : > { %1491 = vmatprep.subr.bf16.mxu1 %v1081_v18 }
 0x2a5   : > { %1178 = vperm.xlu1 %1603, %v1985_v6   ;;  %1182 = vperm.xlu0 %1602, %v1996_v9  }
 0x2a7   : > { %1477 = vmatmul.mubr.msk.bf16.gmra.mrb[4].mxu1 %vm816_vm10, %v1616_v16  ;;  %v1619_v16 = vld [vmem:[%s2426_s3 + $0x28] sm:$0xff]  }
 0x2a8   : > { %1150 = vmatprep.mubr.bf16.mxu1 %v1762_v0 }
 0x2a9   : > { %1604 = vset.pattern.permute.xlu1 %v1775_v55  ;;  %1605 = vset.pattern.permute.xlu0 %v1775_v55 }
 0x2aa   : > { %1268 = vperm.xlu1 %1604, %v1980_v5   ;;  %1272 = vperm.xlu0 %1605, %v1991_v8  }
 0x2ae   : > { %1276 = vperm.xlu1 %1604, %v1985_v6   ;;  %1606 = vset.pattern.permute.xlu0 %v1776_v56 }
 0x2af   : > { %1292 = vperm.xlu0 %1606, %v1980_v5  }
 0x2b2   : > { %1280 = vperm.xlu1 %1604, %v1996_v9  }
 0x2b3   : > { %1304 = vperm.xlu0 %1606, %v1996_v9  }
 0x2b6   : > { %1607 = vset.pattern.permute.xlu1 %v1776_v56 }
 0x2b7   : > { %1296 = vperm.xlu1 %1607, %v1991_v8  }
 0x2bb   : > { %1300 = vperm.xlu1 %1607, %v1985_v6  }
 0x2d3   : > { %v803_v51 = vpop.permute.xlu0 %802 }
 0x2d4   : > { %v797_v53 = vpop.permute.xlu1 %796 }
 0x2d7   : > { %v795_v57 = vpop.permute.xlu0 %794 }
 0x2d8   : > { %v822_v52 = vsel %vm816_vm10, %v795_v57, %v797_v53 }
 0x2d9   : > { %v801_v54 = vpop.permute.xlu1 %800  ;;  %852 = vmatprep.subr.bf16.mxu0 %v822_v52 }
 0x2da   : > { %v824_v60 = vsel %vm816_vm10, %v801_v54, %v803_v51 }
 0x2db   : > { %v793_v58 = vpop.permute.xlu0 %792 }
 0x2dc   : > { %v821_v59 = vsel %vm816_vm10, %v793_v58, %v795_v57 }
 0x2dd   : > { %v799_v5 = vpop.permute.xlu1 %798  ;;  %853 = vmatpush1.bf16.msra.mxu0 %v821_v59 }
 0x2de   : > { %854 = vmatprep.subr.bf16.mxu0 %v824_v60  ;;  %v823_v9 = vsel %vm816_vm10, %v799_v5, %v801_v54 }
 0x2e1   : > { %855 = vmatpush1.bf16.msra.mxu0 %v823_v9 }
 0x2eb   : > { %v815_v8 = vpop.permute.xlu0 %814 }
 0x2ec   : > { %v809_v6 = vpop.permute.xlu1 %808 }
 0x2ef   : > { %v807_v62 = vpop.permute.xlu0 %806 }
 0x2f0   : > { %v826_v63 = vsel %vm816_vm10, %v807_v62, %v809_v6 }
 0x2f1   : > { %v813_v1 = vpop.permute.xlu1 %812  ;;  %856 = vmatprep.subr.bf16.mxu0 %v826_v63 }
 0x2f2   : > { %v828_v47 = vsel %vm816_vm10, %v813_v1, %v815_v8 }
 0x2f3   : > { %v805_v3 = vpop.permute.xlu0 %804 }
 0x2f4   : > { %v825_v7 = vsel %vm816_vm10, %v805_v3, %v807_v62 }
 0x2f5   : > { %v1049_v2 = vpop.permute.xlu1 %1048  ;;  %857 = vmatpush1.bf16.msra.mxu0 %v825_v7 }
 0x2f6   : > { %v1080_v10 = vsel %vm974_vm7, %v1049_v2, %v1051_v50  ;;  %858 = vmatprep.subr.bf16.mxu0 %v828_v47 }
 0x2f7   : > { %1497 = vmatpush1.bf16.msra.mxu1 %v1080_v10  ;;  %v811_v11 = vpop.permute.xlu0 %810 }
 0x2f8   : > { %v827_v13 = vsel %vm816_vm10, %v811_v11, %v813_v1 }
 0x2f9   : > { %v1059_v19 = vpop.permute.xlu1 %1058  ;;  %859 = vmatpush1.bf16.msra.mxu0 %v827_v13 }
 0x2fa   : > { %1108 = vmatprep.subr.bf16.mxu0 %v1079_v36 }
 0x2fb   : > { %v1057_v15 = vpop.permute.xlu0 %1056 }
 0x2fc   : > { %1472 = vmatmul.mubr.msk.bf16.vlgmr.msra.gmra.mrb[8].mxu0 %vm816_vm10, %v1615_v17  ;;  %v1083_v21 = vsel %vm974_vm7, %v1057_v15, %v1059_v19 }
 0x2fd   : > { %v1063_v14 = vpop.permute.xlu1 %1062  ;;  %1109 = vmatpush1.bf16.msra.mxu0 %v2248_v48  ;;  %1492 = vmatprep.subr.bf16.mxu1 %v1083_v21 }
 0x2fe   : > { %1110 = vmatprep.subr.bf16.mxu0 %v1081_v18  ;;  %890 = vmatprep.mubr.bf16.mxu0 %v1762_v0 }
 0x2ff   : > { %v1055_v20 = vpop.permute.xlu0 %1054 }
 0x300   : > { %v1082_v12 = vsel %vm974_vm7, %v1055_v20, %v1057_v15 }
 0x301   : > { %v1061_v42 = vpop.permute.xlu1 %1060  ;;  %1111 = vmatpush1.bf16.msra.mxu0 %v1080_v10  ;;  %1498 = vmatpush1.bf16.msra.mxu1 %v1082_v12 }
 0x302   : > { %1112 = vmatprep.subr.bf16.mxu0 %v1083_v21  ;;  %v1084_v61 = vsel %vm974_vm7, %v1061_v42, %v1063_v14 }
 0x303   : > { %v1065_v43 = vpop.permute.xlu0 %1064 }
 0x304   : > { %v1085_v44 = vsel %vm974_vm7, %v1063_v14, %v1065_v43  ;;  %1473 = vmatmul.mubr.msk.bf16.gmra.mrb[12].mxu0 %vm816_vm10, %v1617_v41 }
 0x305   : > { %v1071_v23 = vpop.permute.xlu1 %1070  ;;  %1113 = vmatpush1.bf16.msra.mxu0 %v1082_v12  ;;  %1493 = vmatprep.subr.bf16.mxu1 %v1085_v44 }
 0x306   : > { %1114 = vmatprep.subr.bf16.mxu0 %v1085_v44  ;;  %1499 = vmatpush1.bf16.msra.mxu1 %v1084_v61 }
 0x307   : > { %v1069_v4 = vpop.permute.xlu0 %1068  ;;  %1140 = vmatprep.mubr.bf16.mxu0 %v1762_v0  ;;  %v1618_v0 = vld [vmem:[%s2426_s3 + $0x20] sm:$0xff]  }
 0x308   : > { %v1087_v45 = vsel %vm974_vm7, %v1069_v4, %v1071_v23 }
 0x309   : > { %v1075_v33 = vpop.permute.xlu1 %1074  ;;  %1115 = vmatpush1.bf16.msra.mxu0 %v1084_v61  ;;  %1494 = vmatprep.subr.bf16.mxu1 %v1087_v45 }
 0x30a   : > { %1116 = vmatprep.subr.bf16.mxu0 %v1087_v45 }
 0x30b   : > { %v1067_v46 = vpop.permute.xlu0 %1066 }
 0x30c   : > { %v1086_v48 = vsel %vm974_vm7, %v1067_v46, %v1069_v4 }
 0x30d   : > { %1117 = vmatpush1.bf16.msra.mxu0 %v1086_v48  ;;  %1500 = vmatpush1.bf16.msra.mxu1 %v1086_v48  ;;  %v1073_v36 = vpop.permute.xlu1 %1072 }
 0x30e   : > { %v1088_v18 = vsel %vm974_vm7, %v1073_v36, %v1075_v33 }
 0x30f   : > { %v1077_v49 = vpop.permute.xlu0 %1076 }
 0x310   : > { %v1089_v50 = vsel %vm974_vm7, %v1075_v33, %v1077_v49 }
 0x311   : > { %1118 = vmatprep.subr.bf16.mxu0 %v1089_v50  ;;  %1495 = vmatprep.subr.bf16.mxu1 %v1089_v50 }
 0x312   : > { %1119 = vmatpush1.bf16.msra.mxu0 %v1088_v18  ;;  %1501 = vmatpush1.bf16.msra.mxu1 %v1088_v18 }
 0x315   : > { %1480 = vmatmul.mubr.msk.bf16.vlgmr.msra.gmra.mrb[16].mxu0 %vm816_vm10, %v1618_v0  ;;  %1481 = vmatmul.mubr.msk.bf16.vlgmr.msra.gmra.mrb[4].mxu1 %vm816_vm10, %v1619_v16 }
 0x320   : > { %v1175_v1 = vpop.permute.xlu1 %1174  ;;  %v1171_v3 = vpop.permute.xlu0 %1170 }
 0x324   : > { %v1179_v7 = vpop.permute.xlu1 %1178  ;;  %v1183_v4 = vpop.permute.xlu0 %1182 }
 0x372   : > { %v951_v55 = vpop.f32.mrb[0].mxu1 }
 0x373   : > { %v953_v56 = vpop.f32.mrb[1].mxu1 }
 0x374   : > { %v955_v51 = vpop.f32.mrb[2].mxu1 }
 0x375   : > { %v957_v53 = vpop.f32.mrb[3].mxu1 }
 0x3cf   : > { %v882_v57 = vpop.f32.mrb[8].mxu0 }
 0x3d0   : > { %v952_v52 = vadd.f32 %v951_v55, %v882_v57  ;;  %v884_v54 = vpop.f32.mrb[9].mxu0 }
 0x3d1   : > { %v954_v58 = vadd.f32 %v953_v56, %v884_v54  ;;  %v886_v59 = vpop.f32.mrb[10].mxu0 }
 0x3d2   : > { %v956_v5 = vadd.f32 %v955_v51, %v886_v59  ;;  %v888_v60 = vpop.f32.mrb[11].mxu0 }
 0x3d3   : > { %v958_v9 = vadd.f32 %v957_v53, %v888_v60 }
 0x3d7   : > { %v892_v8 = vpop.f32.mrb[12].mxu0 }
 0x3d8   : > { %v894_v6 = vpop.f32.mrb[13].mxu0 }
 0x3d9   : > { %v896_v62 = vpop.f32.mrb[14].mxu0 }
 0x3da   : > { %v898_v63 = vpop.f32.mrb[15].mxu0 }
 0x3e8   : > { %v1142_v2 = vpop.f32.mrb[16].mxu0  ;;  %v1152_v47 = vpop.f32.mrb[4].mxu1 }
 0x3e9   : > { %v1161_v10 = vadd.f32 %v1142_v2, %v952_v52  ;;  %v1510_v11 = vadd.f32 %v1152_v47, %v892_v8  ;;  %v1144_v13 = vpop.f32.mrb[17].mxu0  ;;  %v1154_v17 = vpop.f32.mrb[5].mxu1 }
 0x3ea   : > { %v1162_v19 = vadd.f32 %v1144_v13, %v954_v58  ;;  %v1511_v15 = vadd.f32 %v1154_v17, %v894_v6  ;;  %v1146_v21 = vpop.f32.mrb[18].mxu0  ;;  %v1156_v14 = vpop.f32.mrb[6].mxu1 }
 0x3eb   : > { %v2308_v20 = vadd.f32 %v1171_v3, %v1161_v10  ;;  %v1163_v12 = vadd.f32 %v1146_v21, %v956_v5  ;;  %v1512_v41 = vadd.f32 %v1156_v14, %v896_v62  ;;  %v1148_v42 = vpop.f32.mrb[19].mxu0  ;;  %v1158_v43 = vpop.f32.mrb[7].mxu1  ;;  %v2312_v45 = vadd.f32 %v1510_v11, %v1179_v7 }
 0x3ec   : > { %v2310_v44 = vadd.f32 %v1171_v3, %v1162_v19  ;;  %v1164_v61 = vadd.f32 %v1148_v42, %v958_v9  ;;  %v1513_v23 = vadd.f32 %v1158_v43, %v898_v63  ;;  %v2316_v46 = vadd.f32 %v1511_v15, %v1179_v7 }
 0x3ed   : > { %v2314_v33 = vadd.f32 %v1175_v1, %v1163_v12  ;;  %v1213_v36 = vmul.f32 %v2308_v20, %v2308_v20  ;;  %v2326_v18 = vadd.f32 %v1512_v41, %v1183_v4  ;;  %v1217_v51 = vmul.f32 %v2312_v45, %v2312_v45 }
 0x3ee   : > { %v2318_v48 = vadd.f32 %v1175_v1, %v1164_v61  ;;  %v1214_v0 = vmul.f32 %v2310_v44, %v2310_v44  ;;  %v2334_v56 = vadd.f32 %v1513_v23, %v1183_v4  ;;  %v1218_v52 = vmul.f32 %v2316_v46, %v2316_v46 }
 0x3ef   : > { %v1193_v49 = vadd.f32 %v2314_v33, %v2308_v20  ;;  %v1215_v50 = vmul.f32 %v2314_v33, %v2314_v33  ;;  %v1219_v60 = vmul.f32 %v2326_v18, %v2326_v18 }
 0x3f0   : > { %v1202_v16 = vadd.f32 %v2318_v48, %v2310_v44  ;;  %v1216_v55 = vmul.f32 %v2318_v48, %v2318_v48  ;;  %v1220_v6 = vmul.f32 %v2334_v56, %v2334_v56 }
 0x3f1   : > { %v1221_v53 = vadd.f32 %v1215_v50, %v1213_v36  ;;  %v1194_v57 = vadd.f32 %v1193_v49, %v2312_v45 }
 0x3f2   : > { %v1230_v54 = vadd.f32 %v1216_v55, %v1214_v0  ;;  %v1203_v58 = vadd.f32 %v1202_v16, %v2316_v46 }
 0x3f3   : > { %v1222_v59 = vadd.f32 %v1221_v53, %v1217_v51  ;;  %v1195_v5 = vadd.f32 %v1194_v57, %v2326_v18  ;;  %v1269_v57 = vpop.permute.xlu1 %1268 }
 0x3f4   : > { %v1231_v9 = vadd.f32 %v1230_v54, %v1218_v52  ;;  %v1204_v8 = vadd.f32 %v1203_v58, %v2334_v56 }
 0x3f5   : > { %v1196_v62 = vrot.slane %v1195_v5, 4  ;;  %v1223_v63 = vadd.f32 %v1222_v59, %v1219_v60 }
 0x3f6   : > { %v1205_v1 = vrot.slane %v1204_v8, 4  ;;  %v1232_v3 = vadd.f32 %v1231_v9, %v1220_v6 }
 0x3f7   : > { %v1197_v7 = vadd.f32 %v1196_v62, %v1195_v5  ;;  %v1224_v2 = vrot.slane %v1223_v63, 4 }
 0x3f8   : > { %v1206_v47 = vadd.f32 %v1205_v1, %v1204_v8  ;;  %v1233_v10 = vrot.slane %v1232_v3, 4 }
 0x3f9   : > { %v1198_v11 = vrot.slane %v1197_v7, 2  ;;  %v1225_v13 = vadd.f32 %v1224_v2, %v1223_v63 }
 0x3fa   : > { %v1207_v17 = vrot.slane %v1206_v47, 2  ;;  %v1234_v19 = vadd.f32 %v1233_v10, %v1232_v3 }
 0x3fb   : > { %v1199_v15 = vadd.f32 %v1198_v11, %v1197_v7  ;;  %v1226_v21 = vrot.slane %v1225_v13, 2  ;;  %v1277_v7 = vpop.permute.xlu1 %1276 }
 0x3fc   : > { %v1208_v14 = vadd.f32 %v1207_v17, %v1206_v47  ;;  %v1235_v12 = vrot.slane %v1234_v19, 2 }
 0x3fd   : > { %v1200_v41 = vrot.slane %v1199_v15, 1  ;;  %v1227_v42 = vadd.f32 %v1226_v21, %v1225_v13 }
 0x3fe   : > { %v1209_v43 = vrot.slane %v1208_v14, 1  ;;  %v1236_v61 = vadd.f32 %v1235_v12, %v1234_v19 }
 0x3ff   : > { %v1201_v23 = vadd.f32 %v1200_v41, %v1199_v15  ;;  %v1228_v4 = vrot.slane %v1227_v42, 1 }
 0x400   : > { %v1210_v36 = vadd.f32 %v1209_v43, %v1208_v14  ;;  %v1237_v49 = vrot.slane %v1236_v61, 1 }
 0x401   : > { %v1211_v50 = vmul.f32 0.03125, %v1201_v23  ;;  %v1229_v0 = vadd.f32 %v1228_v4, %v1227_v42 }
 0x402   : > { %v1212_v16 = vmul.f32 0.03125, %v1210_v36  ;;  %v1238_v55 = vadd.f32 %v1237_v49, %v1236_v61 }
 0x403   : > { %v1239_v51 = vmul.f32 0.03125, %v1229_v0  ;;  %v1241_v53 = vmul.f32 %v1211_v50, %v1211_v50  ;;  %v1251_v52 = vsub.f32 %v2308_v20, %v1211_v50  ;;  %v1255_v54 = vsub.f32 %v2312_v45, %v1211_v50 }
 0x404   : > { %v1240_v58 = vmul.f32 0.03125, %v1238_v55  ;;  %v1242_v59 = vmul.f32 %v1212_v16, %v1212_v16  ;;  %v1252_v5 = vsub.f32 %v2310_v44, %v1212_v16  ;;  %v1256_v60 = vsub.f32 %v2316_v46, %v1212_v16  ;;  %v1273_v44 = vpop.permute.xlu0 %1272  ;;  %v1281_v46 = vpop.permute.xlu1 %1280 }
 0x405   : > { %v1243_v9 = vsub.f32 %v1239_v51, %v1241_v53  ;;  %v1257_v8 = vsub.f32 %v2326_v18, %v1211_v50  ;;  %v1258_v6 = vsub.f32 %v2334_v56, %v1212_v16  ;;  %v1253_v62 = vsub.f32 %v2314_v33, %v1211_v50 }
 0x406   : > { %v1244_v63 = vsub.f32 %v1240_v58, %v1242_v59  ;;  %v1254_v1 = vsub.f32 %v2318_v48, %v1212_v16 }
 0x407   : > { %v1245_v20 = vmax.f32 %v1243_v9, 0.0 }
 0x408   : > { %v1246_v3 = vmax.f32 %v1244_v63, 0.0  ;;  %v1297_v47 = vpop.permute.xlu1 %1296  ;;  %v1293_v10 = vpop.permute.xlu0 %1292 }
 0x409   : > { %v1247_v45 = vadd.f32 1e-06, %v1245_v20 }
 0x40a   : > { %v1248_v2 = vadd.f32 1e-06, %v1246_v3 }
 0x40b   : > { %1624 = vrsqrt.f32 %v1247_v45 }
 0x40c   : > { %1626 = vrsqrt.f32 %v1248_v2  ;;  %v1301_v36 = vpop.permute.xlu1 %1300  ;;  %v1305_v49 = vpop.permute.xlu0 %1304 }
 0x415   : > { %v1625_v18 = vpop.eup %1624 }
 0x416   : > { %v1627_v56 = vpop.eup %1626  ;;  %v1259_v11 = vmul.f32 %v1625_v18, %v1251_v52  ;;  %v1263_v13 = vmul.f32 %v1625_v18, %v1255_v54  ;;  %v1265_v33 = vmul.f32 %v1625_v18, %v1257_v8  ;;  %v1261_v17 = vmul.f32 %v1625_v18, %v1253_v62 }
 0x417   : > { %v1260_v19 = vmul.f32 %v1627_v56, %v1252_v5  ;;  %v1264_v48 = vmul.f32 %v1627_v56, %v1256_v60  ;;  %v1266_v15 = vmul.f32 %v1627_v56, %v1258_v6  ;;  %v1262_v21 = vmul.f32 %v1627_v56, %v1254_v1 }
 0x418   : > { %v1283_v14 = vmul.f32 %v1269_v57, %v1259_v11  ;;  %v1287_v12 = vmul.f32 %v1277_v7, %v1263_v13  ;;  %v1289_v41 = vmul.f32 %v1281_v46, %v1265_v33  ;;  %v1285_v42 = vmul.f32 %v1273_v44, %v1261_v17 }
 0x419   : > { %v1284_v43 = vmul.f32 %v1269_v57, %v1260_v19  ;;  %v1288_v61 = vmul.f32 %v1277_v7, %v1264_v48  ;;  %v1290_v23 = vmul.f32 %v1281_v46, %v1266_v15  ;;  %v1286_v4 = vmul.f32 %v1273_v44, %v1262_v21 }
 0x41a   : > { %v1309_v50 = vadd.f32 %v1297_v47, %v1285_v42  ;;  %v1307_v0 = vadd.f32 %v1293_v10, %v1283_v14  ;;  %v1311_v16 = vadd.f32 %v1301_v36, %v1287_v12  ;;  %v1313_v55 = vadd.f32 %v1305_v49, %v1289_v41 }
 0x41b   : > { %v1310_v51 = vadd.f32 %v1297_v47, %v1286_v4  ;;  %v1308_v53 = vadd.f32 %v1293_v10, %v1284_v43  ;;  %v1312_v52 = vadd.f32 %v1301_v36, %v1288_v61  ;;  %v1314_v54 = vadd.f32 %v1305_v49, %v1290_v23 }
 0x41c   : > { %v1317_v58 = vmax.f32 %v1309_v50, 0.0  ;;  %v1315_v59 = vmax.f32 %v1307_v0, 0.0  ;;  %v1319_v5 = vmax.f32 %v1311_v16, 0.0  ;;  %v1321_v57 = vmax.f32 %v1313_v55, 0.0 }
 0x41d   : > { %v1318_v60 = vmax.f32 %v1310_v51, 0.0  ;;  %v1316_v9 = vmax.f32 %v1308_v53, 0.0  ;;  %v1320_v8 = vmax.f32 %v1312_v52, 0.0  ;;  %v1322_v6 = vmax.f32 %v1314_v54, 0.0 }
 0x41e   : > { %v1325_v62 = vadd.f32 %v1317_v58, %v540_v32  ;;  %v1323_v63 = vadd.f32 %v1315_v59, %v538_v31  ;;  %v1327_v1 = vadd.f32 %v1319_v5, %v542_v37  ;;  %v1329_v20 = vadd.f32 %v1321_v57, %v544_v34 }
 0x41f   : > { %v1326_v22 = vadd.f32 %v1318_v60, %v541_v35  ;;  %v1324_v24 = vadd.f32 %v1316_v9, %v539_v38  ;;  %v1328_v25 = vadd.f32 %v1320_v8, %v543_v40  ;;  %v1330_v26 = vadd.f32 %v1322_v6, %v545_v39 }
 0x420   : > { %1333 = vst [vmem:[%s297_s7 + $0x10] sm:$0xff] %v1325_v62  ;;  %1331 = vst [vmem:[%s297_s7] sm:$0xff] %v1323_v63 }
 0x421   : > { %1335 = vst [vmem:[%s297_s7 + $0x20] sm:$0xff] %v1327_v1  ;;  %1337 = vst [vmem:[%s297_s7 + $0x30] sm:$0xff] %v1329_v20 }
 0x422   : > { %1334 = vst [vmem:[%s297_s7 + $0x18] sm:$0xff] %v1326_v22  ;;  %1332 = vst [vmem:[%s297_s7 + $0x8] sm:$0xff] %v1324_v24 }
 0x423   : > { %1336 = vst [vmem:[%s297_s7 + $0x28] sm:$0xff] %v1328_v25  ;;  %1338 = vst [vmem:[%s297_s7 + $0x38] sm:$0xff] %v1330_v26 }
 0x424   : > { %1699 = shalt.err (!%p1696_p7)
}
 0x425   : > { %s1700_s28 = scalar_lea.hbm %s2369_s19, 1024  ;;  %s1704_s26 = scalar_lea.hbm %s2429_s6, 2048 }
 0x426   : > { %p1701_p3 = scmp.ne.s32.totalorder %s2369_s19, %s1700_s28  ;;  %p1705_p11 = scmp.lt.u32.totalorder %s2369_s19, %s2429_s6 }
 0x427   : > { %p1706_p8 = scmp.lt.u32.totalorder %s1704_s26, %s1700_s28  ;;  %p1708_p10 = scmp.lt.u32.totalorder %s1700_s28, %s2369_s19 }
 0x428   : > { %p1702_p12 = pnand %p1701_p3, %p2449_p2 }
 0x429   : > { %p1707_p9 = por %p1706_p8, %p1705_p11 }
 0x42a   : > { %p1703_p1 = pneg %p1702_p12 }
 0x42b   : > { %p1709_p4 = por %p1708_p10, %p1707_p9 }
 0x42d   : > { %p1710_p5 = pnand %p1709_p4, %p1703_p1 }
 0x42f   : > { %1713 = shalt.err (!%p1710_p5)
}
 0x430   : > { %s1778_s7 = smov 256   ;;  %s1779_s25 = smov 16  }
 0x431   : > { %1524 = dma.vmem_to_hbm [thread:$0]  (%p2449_p2), %s2371_s13, 1024, %s2369_s19, %s1340_s30, %s1778_s7, %s1778_s7, %s1779_s25  }
 0x432 PF: > { %s1368_s18 = sand.u32 1, %s1744_s21   ;;  %p2450_p0 = scmp.ne.s32.totalorder %s2439_s10, 0 }
 0x433   : > { %p2451_p6 = scmp.ge.s32.totalorder %s1756_s24, 2  ;;  %s1369_s8 = scalar_lea.sflag [#allocation4], %s1368_s18 }
 0x435   : > { %p1535_p13 = pnand %p2451_p6, %p2450_p0 }
 0x437   : > { %1739 = dma.done.wait (!%p1535_p13), %s1369_s8, 1024  }
 0x438   : > { %1741 = vsyncadd (!%p1535_p13), %s1369_s8, 4294966272  ;;  %s2452_s11 = sld [smem:[#allocation11_spill]]  ;;  %p20_p7 = scmp.ge.s32.totalorder %s1840_s27, 4  }
 0x439   : > { %s2453_s21 = smov %s1748_s22  ;;  %s2454_s22 = smov %s1752_s23 }
 0x43a   : > { %s2456_s24 = smov %s1840_s27  ;;  %22 = sbr.rel (!%p20_p7) target bundleno = 6 (0x6), region = 96 }
 0x43e   : > { %s2455_s23 = smov %s2452_s11 }
 0x441   :  { %1374 = vsyncpa [#allocation3], 1 }
 0x442   :  { %1376 = vsyncpa [#allocation3 + $0x1], 1 }
 0x443   :  { %1377 = vsyncpa [#allocation6], 1 }
 0x444   :  { %1378 = vsyncpa [#allocation4], 1 }
 0x445   :  { %1380 = vsyncpa [#allocation4 + $0x1], 1 }

</bundles_post_ra>
